<compile_context>
chip_gen: v7x
topology: tpu7x:2x2x1
jax: 0.10.0
libtpu: 0.0.40
codegen_flags: <defaults>
</compile_context>

<pallas_src>
import functools

import jax
import jax.numpy as jnp
from jax import lax
from jax.experimental import pallas as pl
from jax.experimental.pallas import tpu as pltpu

HIDDEN = 768  # fixed by nn.Linear(768, 1) in the PyTorch module

# (per-streaming-buffer bf16 budget, vmem_limit_bytes) per TPU generation.
_GEN_CFG = {
    "v7x":     (12 * 1024 * 1024, 48 * 1024 * 1024),   # 64 MiB physical VMEM
    "v6e":     (40 * 1024 * 1024, 96 * 1024 * 1024),   # 128 MiB physical VMEM
    "v5e":     (24 * 1024 * 1024, 64 * 1024 * 1024),   # 128 MiB, 16 MiB default scoped
    "unknown": (12 * 1024 * 1024, 48 * 1024 * 1024),   # conservative (v7x-safe)
}


def _tpu_generation():
    try:
        kind = jax.devices()[0].device_kind.lower()
    except Exception:
        kind = ""
    if "v7" in kind:
        return "v7x"
    if "v6" in kind:
        return "v6e"
    if "v5e" in kind or "v5 lite" in kind or "v5litepod" in kind:
        return "v5e"
    return "unknown"


def _select_tiles(B, S, gen):
    """Pick (tB, Bp, tS, Sp, chunk_s, vmem_limit) for this generation."""
    buf_budget, vmem_limit = _GEN_CFG[gen]

    # Sequence tile: largest tS <= 512 (multiple of 8) that minimizes padding.
    S8 = ((S + 7) // 8) * 8
    cap = min(512, S8)
    tS, Sp = 8, S8
    for cand in range(8, cap + 1, 8):
        Sp_c = pl.cdiv(S8, cand) * cand
        if Sp_c < Sp or (Sp_c == Sp and cand > tS):
            tS, Sp = cand, Sp_c

    # Batch tile: fill the per-buffer VMEM budget (bf16 streaming tile).
    row_bytes = tS * HIDDEN * 2
    tB_cap = max(8, min(256, (buf_budget // row_bytes) // 8 * 8))
    if B <= 8:
        tB, Bp = B, B
    else:
        tB = min(tB_cap, ((B + 7) // 8) * 8)
        if gen == "v7x":
            # Keep >= 2 batch tiles so the "parallel" axis spans both TCs.
            half = max(8, ((((B + 1) // 2) + 7) // 8) * 8)
            tB = min(tB, half)
        Bp = pl.cdiv(B, tB) * tB

    # In-kernel accumulation chunk: bounds the f32 upcast temp to ~4 MiB.
    chunk_s = 8
    for cand in range(8, tS + 1, 8):
        if tS % cand == 0 and tB * cand * HIDDEN * 4 <= 4 * 1024 * 1024:
            chunk_s = cand

    return tB, Bp, tS, Sp, chunk_s, vmem_limit


def _reward_kernel(emb_ref, wp_ref, bp_ref, wr_ref, br_ref, out_ref, acc_ref,
                   *, chunk_s):
    """Weighted-sum pooling over sequence tiles -> tanh pooler -> reward head.

    emb_ref : (tB, tS, H) bf16  embeddings pre-scaled by mask / seq-length
    wp_ref  : (H, H)      bf16  pooler dense weight (resident: constant index)
    bp_ref  : (1, H)      f32   pooler dense bias
    wr_ref  : (1, H)      f32   reward_layer weight (row vector)
    br_ref  : (1, 1)      f32   reward_layer bias (SMEM scalar)
    out_ref : (tB, 1)     f32   reward
    acc_ref : (tB, H)     f32   scratch accumulator (persists over seq axis)
    """
    s = pl.program_id(1)

    @pl.when(s == 0)
    def _init():
        acc_ref[...] = jnp.zeros_like(acc_ref)

    tS = emb_ref.shape[1]
    n_chunks = tS // chunk_s

    if n_chunks == 1:
        # Small tile: single conversion + reduce (temp is tiny).
        acc_ref[...] += jnp.sum(emb_ref[...].astype(jnp.float32), axis=1)
    else:
        # Chunked convert-and-accumulate: avoids a full-tile f32 VMEM temp.
        def body(c, carry):
            off = pl.multiple_of(c * chunk_s, chunk_s)
            chunk = emb_ref[:, pl.ds(off, chunk_s), :]            # (tB,cS,H) bf16
            acc_ref[...] += jnp.sum(chunk.astype(jnp.float32), axis=1)
            return carry

        lax.fori_loop(0, n_chunks, body, 0, unroll=(n_chunks <= 8))

    @pl.when(s == pl.num_programs(1) - 1)
    def _epilogue():
        pooled_in = acc_ref[...]                                  # (tB, H) f32
        # pooler: tanh(x @ Wp + bp) -- bf16 MXU matmul, f32 accumulate.
        mm = jnp.dot(pooled_in.astype(jnp.bfloat16), wp_ref[...],
                     preferred_element_type=jnp.float32)          # (tB, H)
        pooled = jnp.tanh(mm + bp_ref[...])                       # (tB, H)
        # reward head: Linear(768, 1) as a lane reduction (no 1-wide MXU tile).
        reward = (jnp.sum(pooled * wr_ref[...], axis=-1, keepdims=True)
                  + br_ref[0, 0])
        out_ref[...] = reward.astype(out_ref.dtype)


def reward_model_forward(params, input_ids, token_type_ids,
                         attention_mask=None, pos_ids=None):
    """Matches RewardModel.forward: returns (batch, 1) reward scores."""
    B, S = input_ids.shape
    if pos_ids is None:
        pos_ids = jnp.broadcast_to(
            jnp.arange(S, dtype=jnp.int32)[None, :], (B, S))
    if attention_mask is None:
        attention_mask = jnp.ones((B, S), dtype=jnp.float32)

    gen = _tpu_generation()
    tB, Bp, tS, Sp, chunk_s, vmem_limit = _select_tiles(B, S, gen)

    # --- pad the *small* (B, S) tensors; the big activation comes out padded.
    if (Bp, Sp) != (B, S):
        pad = ((0, Bp - B), (0, Sp - S))
        input_ids = jnp.pad(input_ids, pad)
        token_type_ids = jnp.pad(token_type_ids, pad)
        pos_ids = jnp.pad(pos_ids, pad)
        attention_mask = jnp.pad(attention_mask.astype(jnp.float32), pad)

    # --- glue: mask weights + embedding gather (fused by XLA) ---------------
    mask = attention_mask.astype(jnp.float32)                     # (Bp, Sp)
    denom = jnp.maximum(jnp.sum(mask, axis=1, keepdims=True), 1.0)
    w = mask / denom                                              # (Bp, Sp)

    # TODO(synk): the embedding-table gather has no clean single-Pallas-kernel
    # form; it stays in XLA and the mask weighting fuses into its epilogue so
    # only one bf16 (Bp, Sp, H) tensor is materialized in HBM.
    emb = (jnp.take(params["word_emb"], input_ids, axis=0)
           + jnp.take(params["type_emb"], token_type_ids, axis=0)
           + jnp.take(params["pos_emb"], pos_ids, axis=0))        # f32
    emb_w = (emb * w[:, :, None]).astype(jnp.bfloat16)            # (Bp, Sp, H)

    wp = params["pooler_w"].astype(jnp.bfloat16)                  # (H, H)
    bp = params["pooler_b"].astype(jnp.float32).reshape(1, HIDDEN)
    wr = params["reward_w"].astype(jnp.float32).reshape(1, HIDDEN)
    br = params["reward_b"].astype(jnp.float32).reshape(1, 1)

    grid = (Bp // tB, Sp // tS)

    out = pl.pallas_call(
        functools.partial(_reward_kernel, chunk_s=chunk_s),
        out_shape=jax.ShapeDtypeStruct((Bp, 1), jnp.float32),
        grid_spec=pltpu.PrefetchScalarGridSpec(
            num_scalar_prefetch=0,
            grid=grid,
            in_specs=[
                pl.BlockSpec((tB, tS, HIDDEN), lambda b, s: (b, s, 0)),
                pl.BlockSpec((HIDDEN, HIDDEN), lambda b, s: (0, 0)),
                pl.BlockSpec((1, HIDDEN), lambda b, s: (0, 0)),
                pl.BlockSpec((1, HIDDEN), lambda b, s: (0, 0)),
                pl.BlockSpec(memory_space=pltpu.MemorySpace.SMEM),
            ],
            out_specs=pl.BlockSpec((tB, 1), lambda b, s: (b, 0)),
            scratch_shapes=[pltpu.VMEM((tB, HIDDEN), jnp.float32)],
        ),
        compiler_params=pltpu.CompilerParams(
            dimension_semantics=("parallel", "arbitrary"),
            vmem_limit_bytes=vmem_limit,
        ),
    )(emb_w, wp, bp, wr, br)

    return out[:B]


def init_params(key, vocab_size=100, type_vocab_size=2, max_pos=64):
    ks = jax.random.split(key, 6)
    scale = 0.02
    return {
        "word_emb": scale * jax.random.normal(ks[0], (vocab_size, HIDDEN), jnp.float32),
        "type_emb": scale * jax.random.normal(ks[1], (type_vocab_size, HIDDEN), jnp.float32),
        "pos_emb":  scale * jax.random.normal(ks[2], (max_pos, HIDDEN), jnp.float32),
        "pooler_w": scale * jax.random.normal(ks[3], (HIDDEN, HIDDEN), jnp.float32),
        "pooler_b": jnp.zeros((1, HIDDEN), jnp.float32),
        "reward_w": scale * jax.random.normal(ks[4], (1, HIDDEN), jnp.float32),
        "reward_b": jnp.zeros((1, 1), jnp.float32),
    }


if __name__ == "__main__":
    key = jax.random.PRNGKey(0)
    pkey, ikey, tkey = jax.random.split(key, 3)

    B, S = 2, 8
    params = init_params(pkey)

    input_ids = jax.random.randint(ikey, (B, S), 0, 100, dtype=jnp.int32)
    token_type_ids = jax.random.randint(tkey, (B, S), 0, 2, dtype=jnp.int32)
    # mask out the tail of the second sequence to exercise attention_mask
    attention_mask = jnp.array(
        [[1] * S, [1] * (S - 3) + [0] * 3], dtype=jnp.float32)

    reward = reward_model_forward(params, input_ids, token_type_ids,
                                  attention_mask=attention_mask)
    reward = jax.block_until_ready(reward)
    assert reward.shape == (B, 1) and reward.dtype == jnp.float32

    # pure-JAX f32 reference (tolerance check of the bf16 kernel path)
    pos_ids = jnp.broadcast_to(jnp.arange(S, dtype=jnp.int32)[None, :], (B, S))
    denom = jnp.maximum(jnp.sum(attention_mask, axis=1, keepdims=True), 1.0)
    emb_ref = (jnp.take(params["word_emb"], input_ids, axis=0)
               + jnp.take(params["type_emb"], token_type_ids, axis=0)
               + jnp.take(params["pos_emb"], pos_ids, axis=0))
    pooled_sum = jnp.einsum("bs,bsh->bh", attention_mask / denom, emb_ref)
    pooled_ref = jnp.tanh(pooled_sum @ params["pooler_w"] + params["pooler_b"])
    ref = pooled_ref @ params["reward_w"].T + params["reward_b"]
    assert jnp.allclose(reward, ref, rtol=1e-1, atol=1e-3)

    print("KERNEL_OK")
</pallas_src>

<mosaic_0001>
module attributes {stable_mosaic.version = 11 : i64} {
  func.func @_reward_kernel(%arg0: i32, %arg1: i32, %arg2: memref<2x8x768xbf16, #tpu.memory_space<vmem>>, %arg3: memref<768x768xbf16, #tpu.memory_space<vmem>>, %arg4: memref<1x768xf32, #tpu.memory_space<vmem>>, %arg5: memref<1x768xf32, #tpu.memory_space<vmem>>, %arg6: memref<1x1xf32, #tpu.memory_space<smem>>, %arg7: memref<2x1xf32, #tpu.memory_space<vmem>>, %arg8: memref<2x768xf32, #tpu.memory_space<vmem>>) attributes {dimension_semantics = [#tpu.dimension_semantics<parallel>, #tpu.dimension_semantics<arbitrary>], iteration_bounds = array<i64: 1, 1>, scalar_prefetch = 0 : i64, scratch_operands = 1 : i64, tpu.core_type = #tpu.core_type<tc>, window_params = [{transform_indices = @transform_0, window_bounds = array<i64: 2, 8, 768>}, {pipeline_mode = #tpu.pipeline_mode<synchronous>, transform_indices = @transform_1, window_bounds = array<i64: 768, 768>}, {pipeline_mode = #tpu.pipeline_mode<synchronous>, transform_indices = @transform_2, window_bounds = array<i64: 1, 768>}, {pipeline_mode = #tpu.pipeline_mode<synchronous>, transform_indices = @transform_3, window_bounds = array<i64: 1, 768>}, {transform_indices = @transform_4, window_bounds = array<i64: 1, 1>}, {transform_indices = @transform_5, window_bounds = array<i64: 2, 1>}]} {
    %c0_i32 = arith.constant 0 : i32
    %0 = arith.cmpi eq, %arg1, %c0_i32 : i32
    %1 = arith.extui %0 : i1 to i32
    %c0_i32_0 = arith.constant 0 : i32
    %2 = arith.cmpi ne, %1, %c0_i32_0 : i32
    scf.if %2 {
      %cst_9 = arith.constant 0.000000e+00 : f32
      %12 = vector.broadcast %cst_9 : f32 to vector<2x768xf32>
      %c0_10 = arith.constant 0 : index
      %c0_11 = arith.constant 0 : index
      %13 = vector.load %arg8[%c0_10, %c0_11] : memref<2x768xf32, #tpu.memory_space<vmem>>, vector<2x768xf32>
      tpu.vector_store %arg8[%c0_10, %c0_11], %12 {strides = array<i32>} : memref<2x768xf32, #tpu.memory_space<vmem>>, vector<2x768xf32>,
    } else {
    }
    %c0 = arith.constant 0 : index
    %c0_1 = arith.constant 0 : index
    %3 = vector.load %arg8[%c0, %c0_1] : memref<2x768xf32, #tpu.memory_space<vmem>>, vector<2x768xf32>
    %c0_2 = arith.constant 0 : index
    %c0_3 = arith.constant 0 : index
    %c0_4 = arith.constant 0 : index
    %4 = vector.load %arg2[%c0_2, %c0_3, %c0_4] : memref<2x8x768xbf16, #tpu.memory_space<vmem>>, vector<2x8x768xbf16>
    %5 = arith.extf %4 : vector<2x8x768xbf16> to vector<2x8x768xf32>
    %cst = arith.constant dense<0.000000e+00> : vector<2x768xf32>
    %6 = vector.multi_reduction <add>, %5, %cst [1] : vector<2x8x768xf32> to vector<2x768xf32>
    %7 = arith.addf %3, %6 : vector<2x768xf32>
    %c0_5 = arith.constant 0 : index
    %c0_6 = arith.constant 0 : index
    %8 = vector.load %arg8[%c0_5, %c0_6] : memref<2x768xf32, #tpu.memory_space<vmem>>, vector<2x768xf32>
    tpu.vector_store %arg8[%c0_5, %c0_6], %7 {strides = array<i32>} : memref<2x768xf32, #tpu.memory_space<vmem>>, vector<2x768xf32>,
    %c0_i32_7 = arith.constant 0 : i32
    %9 = arith.cmpi eq, %arg1, %c0_i32_7 : i32
    %10 = arith.extui %9 : i1 to i32
    %c0_i32_8 = arith.constant 0 : i32
    %11 = arith.cmpi ne, %10, %c0_i32_8 : i32
    scf.if %11 {
      %c0_9 = arith.constant 0 : index
      %c0_10 = arith.constant 0 : index
      %12 = vector.load %arg8[%c0_9, %c0_10] : memref<2x768xf32, #tpu.memory_space<vmem>>, vector<2x768xf32>
      %13 = arith.truncf %12 : vector<2x768xf32> to vector<2x768xbf16>
      %c0_11 = arith.constant 0 : index
      %c0_12 = arith.constant 0 : index
      %14 = vector.load %arg3[%c0_11, %c0_12] : memref<768x768xbf16, #tpu.memory_space<vmem>>, vector<768x768xbf16>
      %cst_13 = arith.constant dense<0.000000e+00> : vector<2x768xf32>
      %15 = tpu.matmul %13, %14, %cst_13 {dimension_numbers = #tpu.dot_dimension_numbers<[1], [0], [0], [1], [0, 0, 1, 1], [], []>} : vector<2x768xbf16>, vector<768x768xbf16>, vector<2x768xf32> -> vector<2x768xf32>
      %c0_14 = arith.constant 0 : index
      %c0_15 = arith.constant 0 : index
      %16 = vector.load %arg4[%c0_14, %c0_15] : memref<1x768xf32, #tpu.memory_space<vmem>>, vector<1x768xf32>
      %17 = vector.broadcast %16 : vector<1x768xf32> to vector<2x768xf32>
      %18 = arith.addf %15, %17 : vector<2x768xf32>
      %19 = math.tanh %18 : vector<2x768xf32>
      %c0_16 = arith.constant 0 : index
      %c0_17 = arith.constant 0 : index
      %20 = vector.load %arg5[%c0_16, %c0_17] : memref<1x768xf32, #tpu.memory_space<vmem>>, vector<1x768xf32>
      %21 = vector.broadcast %20 : vector<1x768xf32> to vector<2x768xf32>
      %22 = arith.mulf %19, %21 : vector<2x768xf32>
      %cst_18 = arith.constant dense<0.000000e+00> : vector<2xf32>
      %23 = vector.multi_reduction <add>, %22, %cst_18 [1] : vector<2x768xf32> to vector<2xf32>
      %24 = vector.shape_cast %23 : vector<2xf32> to vector<2x1xf32>
      %c0_19 = arith.constant 0 : index
      %c0_20 = arith.constant 0 : index
      %25 = memref.load %arg6[%c0_19, %c0_20] : memref<1x1xf32, #tpu.memory_space<smem>>
      %26 = vector.broadcast %25 : f32 to vector<2x1xf32>
      %27 = arith.addf %24, %26 : vector<2x1xf32>
      %c0_21 = arith.constant 0 : index
      %c0_22 = arith.constant 0 : index
      %28 = vector.load %arg7[%c0_21, %c0_22] : memref<2x1xf32, #tpu.memory_space<vmem>>, vector<2x1xf32>
      tpu.vector_store %arg7[%c0_21, %c0_22], %27 {strides = array<i32>} : memref<2x1xf32, #tpu.memory_space<vmem>>, vector<2x1xf32>,
    } else {
    }
    return
  }
  func.func @transform_0(%arg0: i32, %arg1: i32) -> (i32, i32, i32) {
    %c0_i32 = arith.constant 0 : i32
    %c0_i32_0 = arith.constant 0 : i32
    return %arg0, %arg1, %c0_i32 : i32, i32, i32
  }
  func.func @transform_1(%arg0: i32, %arg1: i32) -> (i32, i32) {
    %c0_i32 = arith.constant 0 : i32
    %c0_i32_0 = arith.constant 0 : i32
    %c0_i32_1 = arith.constant 0 : i32
    return %c0_i32, %c0_i32_0 : i32, i32
  }
  func.func @transform_2(%arg0: i32, %arg1: i32) -> (i32, i32) {
    %c0_i32 = arith.constant 0 : i32
    %c0_i32_0 = arith.constant 0 : i32
    %c0_i32_1 = arith.constant 0 : i32
    return %c0_i32, %c0_i32_0 : i32, i32
  }
  func.func @transform_3(%arg0: i32, %arg1: i32) -> (i32, i32) {
    %c0_i32 = arith.constant 0 : i32
    %c0_i32_0 = arith.constant 0 : i32
    %c0_i32_1 = arith.constant 0 : i32
    return %c0_i32, %c0_i32_0 : i32, i32
  }
  func.func @transform_4(%arg0: i32, %arg1: i32) -> (i32, i32) {
    %c0_i32 = arith.constant 0 : i32
    %c0_i32_0 = arith.constant 0 : i32
    %c0_i32_1 = arith.constant 0 : i32
    return %c0_i32, %c0_i32_0 : i32, i32
  }
  func.func @transform_5(%arg0: i32, %arg1: i32) -> (i32, i32) {
    %c0_i32 = arith.constant 0 : i32
    %c0_i32_0 = arith.constant 0 : i32
    return %arg0, %c0_i32 : i32, i32
  }
}

</mosaic_0001>

<bundles_post_ra>
// kernel: tpu_custom_call.1
= control target key start
LH: loop header
LB: loop body
LE: loop exit
PB: predicated region body
PF: predicated region fallthrough
CT: control target
= control target key end

     0   :  { %11 = vsyncpa [#allocation5], 0  ;;  %s3526_s0 = inlined_call_operand.hbm [shape: bf16[2,8,768], index: 0, kind: input, shape index: {}]   ;;  %s3527_s1 = inlined_call_operand.hbm [shape: bf16[768,768], index: 1, kind: input, shape index: {}]   ;;  %s3528_s2 = inlined_call_operand.hbm [shape: f32[1,768], index: 2, kind: input, shape index: {}]   ;;  %s3529_s3 = inlined_call_operand.hbm [shape: f32[1,768], index: 3, kind: input, shape index: {}]   ;;  %s3530_s4 = inlined_call_operand.<no memory space> [shape: f32[1,1], index: 4, kind: input, shape index: {}]   ;;  %s3531_s5 = inlined_call_operand.vmem [shape: f32[2,1], index: 5, kind: output, shape index: {}]  }
   0x1   :  { %12 = vsyncpa [#allocation7], 0 }
   0x2   :  { %13 = vsyncpa [#allocation10], 0  ;;  %s3364_s18 = smov [#allocation6]   ;;  %s3365_s20 = smov [#allocation4]  }
   0x3   :  { %s31_s19 = sshll.u32 %s3364_s18, 4  ;;  %s19_s21 = sshll.u32 %s3365_s20, 4  ;;  %s32_s19 = int_to_ptr.vmem [resolvable:$true] %s31_s19  ;;  %s3402_s21 = int_to_ptr.vmem [resolvable:$true] %s19_s21 }
   0x4   :  { %s3270_s24 = scalar_lea.hbm %s3527_s1, 36864 }
   0x5   :  { %p3271_p0 = scmp.ne.s32.totalorder %s3527_s1, %s3270_s24  ;;  %p3274_p1 = scmp.lt.u32.totalorder %s3270_s24, %s3527_s1 }
   0x7   :  { %p3276_p2 = pnand %p3274_p1, %p3271_p0 }
   0x9   :  { %3279 = shalt.err (!%p3276_p2)
}
   0xa   :  { %s3280_s29 = scalar_lea.vmem %s32_s19, 36864  ;;  %p3285_p4 = scmp.lt.s32.totalorder %s32_s19, %s32_s19 }
   0xb   :  { %p3281_p3 = scmp.ne.s32.totalorder %s32_s19, %s3280_s29  ;;  %p3286_p5 = scmp.lt.s32.totalorder %s3280_s29, %s3280_s29 }
   0xd   :  { %p3287_p6 = por %p3286_p5, %p3285_p4 }
   0xf   :  { %p3288_p7 = pnand %p3287_p6, %p3281_p3 }
  0x11   :  { %3291 = shalt.err (!%p3288_p7)
}
  0x12   :  { %s3366_s30 = smov 384   ;;  %s3367_s6 = smov 24  }
  0x13   :  { %37 = dma.hbm_to_vmem [thread:$0]  %s3527_s1, 36864, %s32_s19, [#allocation7], %s3366_s30, %s3366_s30, %s3367_s6  }
  0x14   :  { %s3292_s11 = scalar_lea.hbm %s3526_s0, 768 }
  0x15   :  { %p3293_p8 = scmp.ne.s32.totalorder %s3526_s0, %s3292_s11  ;;  %p3296_p9 = scmp.lt.u32.totalorder %s3292_s11, %s3526_s0 }
  0x17   :  { %p3298_p10 = pnand %p3296_p9, %p3293_p8 }
  0x19   :  { %3301 = shalt.err (!%p3298_p10)
}
  0x1a   :  { %s3302_s16 = scalar_lea.vmem %s3402_s21, 768  ;;  %p3307_p12 = scmp.lt.s32.totalorder %s3402_s21, %s3402_s21 }
  0x1b   :  { %p3303_p11 = scmp.ne.s32.totalorder %s3402_s21, %s3302_s16  ;;  %p3308_p13 = scmp.lt.s32.totalorder %s3302_s16, %s3302_s16 }
  0x1d   :  { %p3309_p0 = por %p3308_p13, %p3307_p12 }
  0x1f   :  { %p3310_p1 = pnand %p3309_p0, %p3303_p11 }
  0x21   :  { %3313 = shalt.err (!%p3310_p1)
}
  0x22   :  { %25 = dma.hbm_to_vmem [thread:$0]  %s3526_s0, 768, %s3402_s21, [#allocation5], %s3366_s30, %s3366_s30, %s3367_s6  }
  0x23   :  { %s3368_s18 = smov [#allocation8]   ;;  %s3369_s20 = smov [#allocation9]  }
  0x24   :  { %s44_s19 = sshll.u32 %s3368_s18, 4  ;;  %s54_s22 = sshll.u32 %s3369_s20, 4  ;;  %s45_s19 = int_to_ptr.vmem [resolvable:$true] %s44_s19  ;;  %s55_s22 = int_to_ptr.vmem [resolvable:$true] %s54_s22 }
  0x25   :  { %s3314_s25 = scalar_lea.hbm %s3528_s2, 96 }
  0x26   :  { %p3315_p2 = scmp.ne.s32.totalorder %s3528_s2, %s3314_s25  ;;  %p3318_p3 = scmp.lt.u32.totalorder %s3314_s25, %s3528_s2 }
  0x28   :  { %p3320_p4 = pnand %p3318_p3, %p3315_p2 }
  0x2a   :  { %3323 = shalt.err (!%p3320_p4)
}
  0x2b   :  { %s3324_s0 = scalar_lea.vmem %s45_s19, 96  ;;  %p3329_p6 = scmp.lt.s32.totalorder %s45_s19, %s45_s19 }
  0x2c   :  { %p3325_p5 = scmp.ne.s32.totalorder %s45_s19, %s3324_s0  ;;  %p3330_p7 = scmp.lt.s32.totalorder %s3324_s0, %s3324_s0 }
  0x2e   :  { %p3331_p8 = por %p3330_p7, %p3329_p6 }
  0x30   :  { %p3332_p9 = pnand %p3331_p8, %p3325_p5 }
  0x32   :  { %3335 = shalt.err (!%p3332_p9)
}
  0x33   :  { %47 = dma.hbm_to_vmem [thread:$0]  %s3528_s2, 96, %s45_s19, [#allocation7]  }
  0x34   :  { %s3336_s8 = scalar_lea.hbm %s3529_s3, 96 }
  0x35   :  { %p3337_p10 = scmp.ne.s32.totalorder %s3529_s3, %s3336_s8  ;;  %p3340_p11 = scmp.lt.u32.totalorder %s3336_s8, %s3529_s3 }
  0x37   :  { %p3342_p12 = pnand %p3340_p11, %p3337_p10 }
  0x39   :  { %3345 = shalt.err (!%p3342_p12)
}
  0x3a   :  { %s3346_s13 = scalar_lea.vmem %s55_s22, 96  ;;  %p3351_p0 = scmp.lt.s32.totalorder %s55_s22, %s55_s22 }
  0x3b   :  { %p3347_p13 = scmp.ne.s32.totalorder %s55_s22, %s3346_s13  ;;  %p3352_p1 = scmp.lt.s32.totalorder %s3346_s13, %s3346_s13 }
  0x3d   :  { %p3353_p2 = por %p3352_p1, %p3351_p0 }
  0x3f   :  { %p3354_p3 = pnand %p3353_p2, %p3347_p13 }
  0x41   :  { %3357 = shalt.err (!%p3354_p3)
}
  0x42   :  { %57 = dma.hbm_to_vmem [thread:$0]  %s3529_s3, 96, %s55_s22, [#allocation10]  }
  0x43   :  { %3358 = dma.done.wait [#allocation5], 768  }
  0x44   :  { %3359 = vsyncadd [#allocation5], 4294966528 }
  0x45   :  { %3360 = dma.done.wait [#allocation7], 36960  }
  0x46   :  { %3361 = vsyncadd [#allocation7], 4294930336 }
  0x47   :  { %3362 = dma.done.wait [#allocation10], 96  }
  0x48   :  { %3363 = vsyncadd [#allocation10], 4294967200  ;;  %v3370_v0 = vmov 0.0   ;;  %v2826_v1 = vld [vmem:[#allocation6 + $0x4] ss:$24 sps:$4 sm:$0xff]   ;;  %v187_v42 = vlaneseq  ;;  %v80_v54 = vld [vmem:[#allocation4] sm:$0xff] }
  0x49   :  { %77 = vst [vmem:[#allocation2 + $0x8] sm:$0xf] %v3370_v0  ;;  %v2828_v2 = vld [vmem:[#allocation6 + $0x304] ss:$24 sps:$4 sm:$0xff]   ;;  %2062 = vmatprep.subr.bf16.mxu1 %v2826_v1  ;;  %v2830_v3 = vld [vmem:[#allocation6] ss:$24 sps:$4 sm:$0xff]   ;;  %v86_v58 = vunpack.c.l.bf16 %v80_v54  ;;  %v87_v59 = vunpack.c.h.bf16 %v80_v54 }
  0x4a   :  { %v2831_v4 = vld [vmem:[#allocation6 + $0x300] ss:$24 sps:$4 sm:$0xff]   ;;  %2103 = vmatprep.subr.bf16.mxu0 %v2828_v2  ;;  %v2832_v5 = vld [vmem:[#allocation6 + $0x34] ss:$24 sps:$4 sm:$0xff]   ;;  %2063 = vmatpush1.bf16.msra.mxu1 %v2830_v3  ;;  %v2836_v7 = vld [vmem:[#allocation6 + $0x30] ss:$24 sps:$4 sm:$0xff]  }
  0x4b   :  { %2104 = vmatpush1.bf16.msra.mxu0 %v2831_v4  ;;  %v2834_v6 = vld [vmem:[#allocation6 + $0x334] ss:$24 sps:$4 sm:$0xff]   ;;  %2064 = vmatprep.subr.bf16.mxu1 %v2832_v5  ;;  %v2837_v8 = vld [vmem:[#allocation6 + $0x330] ss:$24 sps:$4 sm:$0xff]   ;;  %v2838_v9 = vld [vmem:[#allocation6 + $0x64] ss:$24 sps:$4 sm:$0xff]  }
  0x4c   :  { %2105 = vmatprep.subr.bf16.mxu0 %v2834_v6  ;;  %v2840_v10 = vld [vmem:[#allocation6 + $0x364] ss:$24 sps:$4 sm:$0xff]   ;;  %v2842_v11 = vld [vmem:[#allocation6 + $0x60] ss:$24 sps:$4 sm:$0xff]   ;;  %v2844_v13 = vld [vmem:[#allocation6 + $0x94] ss:$24 sps:$4 sm:$0xff]  }
  0x4d   :  { %v2843_v12 = vld [vmem:[#allocation6 + $0x360] ss:$24 sps:$4 sm:$0xff]   ;;  %v2846_v14 = vld [vmem:[#allocation6 + $0x394] ss:$24 sps:$4 sm:$0xff]   ;;  %v2848_v15 = vld [vmem:[#allocation6 + $0x90] ss:$24 sps:$4 sm:$0xff]  }
  0x4e   :  { %2065 = vmatpush1.bf16.msra.mxu1 %v2836_v7  ;;  %v2849_v16 = vld [vmem:[#allocation6 + $0x390] ss:$24 sps:$4 sm:$0xff]   ;;  %v2850_v17 = vld [vmem:[#allocation6 + $0xc4] ss:$24 sps:$4 sm:$0xff]   ;;  %v2854_v19 = vld [vmem:[#allocation6 + $0xc0] ss:$24 sps:$4 sm:$0xff]  }
  0x4f   :  { %2106 = vmatpush1.bf16.msra.mxu0 %v2837_v8  ;;  %2066 = vmatprep.subr.bf16.mxu1 %v2838_v9  ;;  %v2852_v18 = vld [vmem:[#allocation6 + $0x3c4] ss:$24 sps:$4 sm:$0xff]   ;;  %v2855_v20 = vld [vmem:[#allocation6 + $0x3c0] ss:$24 sps:$4 sm:$0xff]   ;;  %v2856_v21 = vld [vmem:[#allocation6 + $0xf4] ss:$24 sps:$4 sm:$0xff]  }
  0x50   :  { %2107 = vmatprep.subr.bf16.mxu0 %v2840_v10  ;;  %v2858_v22 = vld [vmem:[#allocation6 + $0x3f4] ss:$24 sps:$4 sm:$0xff]   ;;  %v2860_v23 = vld [vmem:[#allocation6 + $0xf0] ss:$24 sps:$4 sm:$0xff]   ;;  %v2862_v25 = vld [vmem:[#allocation6 + $0x124] ss:$24 sps:$4 sm:$0xff]  }
  0x51   :  { %v2861_v24 = vld [vmem:[#allocation6 + $0x3f0] ss:$24 sps:$4 sm:$0xff]   ;;  %v2864_v26 = vld [vmem:[#allocation6 + $0x424] ss:$24 sps:$4 sm:$0xff]   ;;  %v2866_v27 = vld [vmem:[#allocation6 + $0x120] ss:$24 sps:$4 sm:$0xff]  }
  0x52   :  { %2067 = vmatpush1.bf16.msra.mxu1 %v2842_v11  ;;  %v2867_v28 = vld [vmem:[#allocation6 + $0x420] ss:$24 sps:$4 sm:$0xff]   ;;  %v2868_v29 = vld [vmem:[#allocation6 + $0x154] ss:$24 sps:$4 sm:$0xff]   ;;  %v2872_v31 = vld [vmem:[#allocation6 + $0x150] ss:$24 sps:$4 sm:$0xff]  }
  0x53   :  { %2108 = vmatpush1.bf16.msra.mxu0 %v2843_v12  ;;  %2068 = vmatprep.subr.bf16.mxu1 %v2844_v13  ;;  %v2870_v30 = vld [vmem:[#allocation6 + $0x454] ss:$24 sps:$4 sm:$0xff]   ;;  %v2873_v32 = vld [vmem:[#allocation6 + $0x450] ss:$24 sps:$4 sm:$0xff]   ;;  %v2874_v33 = vld [vmem:[#allocation6 + $0x184] ss:$24 sps:$4 sm:$0xff]  }
  0x54   :  { %2109 = vmatprep.subr.bf16.mxu0 %v2846_v14  ;;  %v2876_v34 = vld [vmem:[#allocation6 + $0x484] ss:$24 sps:$4 sm:$0xff]   ;;  %v2878_v35 = vld [vmem:[#allocation6 + $0x180] ss:$24 sps:$4 sm:$0xff]   ;;  %v2880_v37 = vld [vmem:[#allocation6 + $0x1b4] ss:$24 sps:$4 sm:$0xff]  }
  0x55   :  { %v2879_v36 = vld [vmem:[#allocation6 + $0x480] ss:$24 sps:$4 sm:$0xff]   ;;  %v2882_v38 = vld [vmem:[#allocation6 + $0x4b4] ss:$24 sps:$4 sm:$0xff]   ;;  %v2884_v39 = vld [vmem:[#allocation6 + $0x1b0] ss:$24 sps:$4 sm:$0xff]  }
  0x56   :  { %2069 = vmatpush1.bf16.msra.mxu1 %v2848_v15  ;;  %v3371_v40 = vmov 1983009808   ;;  %v2885_v43 = vld [vmem:[#allocation6 + $0x4b0] ss:$24 sps:$4 sm:$0xff]   ;;  %v2886_v44 = vld [vmem:[#allocation6 + $0x1e4] ss:$24 sps:$4 sm:$0xff]  }
  0x57   :  { %2110 = vmatpush1.bf16.msra.mxu0 %v2849_v16  ;;  %2070 = vmatprep.subr.bf16.mxu1 %v2850_v17  ;;  %v185_v41 = vunpack.c.l.s4 %v3371_v40  ;;  %v2888_v45 = vld [vmem:[#allocation6 + $0x4e4] ss:$24 sps:$4 sm:$0xff]   ;;  %v2890_v46 = vld [vmem:[#allocation6 + $0x1e0] ss:$24 sps:$4 sm:$0xff]   ;;  %v3457_v49 = vshrl.u32 %v187_v42, 7  ;;  %v83_v56 = vld [vmem:[#allocation4 + $0x18] sm:$0xff] }
  0x58   :  { %2111 = vmatprep.subr.bf16.mxu0 %v2852_v18  ;;  %v2891_v47 = vld [vmem:[#allocation6 + $0x4e0] ss:$24 sps:$4 sm:$0xff]   ;;  %v2892_v50 = vld [vmem:[#allocation6 + $0x214] ss:$24 sps:$4 sm:$0xff]   ;;  %v2896_v52 = vld [vmem:[#allocation6 + $0x210] ss:$24 sps:$4 sm:$0xff]   ;;  %v92_v0 = vunpack.c.l.bf16 %v83_v56  ;;  %v93_v1 = vunpack.c.h.bf16 %v83_v56 }
  0x59   :  { %v186_v48 = vunpack.c.0.s8 %v185_v41  ;;  %v2894_v51 = vld [vmem:[#allocation6 + $0x514] ss:$24 sps:$4 sm:$0xff]   ;;  %v2897_v53 = vld [vmem:[#allocation6 + $0x510] ss:$24 sps:$4 sm:$0xff]   ;;  %v81_v55 = vld [vmem:[#allocation4 + $0x8] sm:$0xff]  ;;  %v98_v5 = vrot.slane %v86_v58, 4 }
  0x5a   :  { %2071 = vmatpush1.bf16.msra.mxu1 %v2854_v19  ;;  %v84_v57 = vld [vmem:[#allocation4 + $0x20] sm:$0xff]  ;;  %v2898_v61 = vld [vmem:[#allocation6 + $0x244] ss:$24 sps:$4 sm:$0xff]   ;;  %v88_v62 = vunpack.c.l.bf16 %v81_v55  ;;  %v89_v63 = vunpack.c.h.bf16 %v81_v55  ;;  %v104_v6 = vrot.slane %v87_v59, 4  ;;  %v134_v9 = vrot.slane %v92_v0, 4 }
  0x5b   :  { %2112 = vmatpush1.bf16.msra.mxu0 %v2855_v20  ;;  %2072 = vmatprep.subr.bf16.mxu1 %v2856_v21  ;;  %v3460_v60 = vsub.s32 %v186_v48, %v3457_v49  ;;  %v2900_v2 = vld [vmem:[#allocation6 + $0x544] ss:$24 sps:$4 sm:$0xff]   ;;  %v94_v3 = vunpack.c.l.bf16 %v84_v57  ;;  %v95_v4 = vunpack.c.h.bf16 %v84_v57  ;;  %v140_v10 = vrot.slane %v93_v1, 4  ;;  %v2902_v11 = vld [vmem:[#allocation6 + $0x240] ss:$24 sps:$4 sm:$0xff]  }
  0x5c   :  { %2113 = vmatprep.subr.bf16.mxu0 %v2858_v22  ;;  %v110_v7 = vrot.slane %v88_v62, 4  ;;  %v116_v8 = vrot.slane %v89_v63, 4  ;;  %v99_v12 = vadd.f32 %v98_v5, %v86_v58  ;;  %v105_v13 = vadd.f32 %v104_v6, %v87_v59  ;;  %v2903_v16 = vld [vmem:[#allocation6 + $0x540] ss:$24 sps:$4 sm:$0xff]   ;;  %v2904_v17 = vld [vmem:[#allocation6 + $0x274] ss:$24 sps:$4 sm:$0xff]  }
  0x5d   :  { %v146_v14 = vrot.slane %v94_v3, 4  ;;  %v152_v15 = vrot.slane %v95_v4, 4  ;;  %v135_v20 = vadd.f32 %v134_v9, %v92_v0  ;;  %v2906_v21 = vld [vmem:[#allocation6 + $0x574] ss:$24 sps:$4 sm:$0xff]   ;;  %v2912_v41 = vld [vmem:[#allocation6 + $0x5a4] ss:$24 sps:$4 sm:$0xff]  }
  0x5e   :  { %2073 = vmatpush1.bf16.msra.mxu1 %v2860_v23  ;;  %v111_v18 = vadd.f32 %v110_v7, %v88_v62  ;;  %v117_v19 = vadd.f32 %v116_v8, %v89_v63  ;;  %v100_v22 = vrot.slane %v99_v12, 2  ;;  %v106_v23 = vrot.slane %v105_v13, 2  ;;  %v2914_v55 = vld [vmem:[#allocation6 + $0x2a0] ss:$24 sps:$4 sm:$0xff]   ;;  %v2916_v62 = vld [vmem:[#allocation6 + $0x2d4] ss:$24 sps:$4 sm:$0xff]  }
  0x5f   :  { %2114 = vmatpush1.bf16.msra.mxu0 %v2861_v24  ;;  %2074 = vmatprep.subr.bf16.mxu1 %v2862_v25  ;;  %v141_v24 = vadd.f32 %v140_v10, %v93_v1  ;;  %v147_v25 = vadd.f32 %v146_v14, %v94_v3  ;;  %v2915_v56 = vld [vmem:[#allocation6 + $0x5a0] ss:$24 sps:$4 sm:$0xff]   ;;  %v2918_v63 = vld [vmem:[#allocation6 + $0x5d4] ss:$24 sps:$4 sm:$0xff]   ;;  %v2920_v5 = vld [vmem:[#allocation6 + $0x2d0] ss:$24 sps:$4 sm:$0xff]  }
  0x60   :  { %2115 = vmatprep.subr.bf16.mxu0 %v2864_v26  ;;  %v112_v26 = vrot.slane %v111_v18, 2  ;;  %v2921_v7 = vld [vmem:[#allocation6 + $0x5d0] ss:$24 sps:$4 sm:$0xff]   ;;  %vm237_vm0 = vcmask 1041409   ;;  %vm239_vm1 = vcmask 1043459   ;;  %vm241_vm2 = vcmask 1045509  }
  0x61   :  { %vm243_vm3 = vcmask 1047559   ;;  %vm2475_vm4 = vcmask 1041408   ;;  %vm2492_vm5 = vcmask 1024  }
  0x62   :  { %2075 = vmatpush1.bf16.msra.mxu1 %v2866_v27  ;;  %v118_v27 = vrot.slane %v117_v19, 2 }
  0x63   :  { %2116 = vmatpush1.bf16.msra.mxu0 %v2867_v28  ;;  %2076 = vmatprep.subr.bf16.mxu1 %v2868_v29  ;;  %v136_v28 = vrot.slane %v135_v20, 2  ;;  %v153_v29 = vadd.f32 %v152_v15, %v95_v4 }
  0x64   :  { %2117 = vmatprep.subr.bf16.mxu0 %v2870_v30  ;;  %v2908_v30 = vld [vmem:[#allocation6 + $0x270] ss:$24 sps:$4 sm:$0xff]  }
  0x65   :  { %v154_v40 = vrot.slane %v153_v29, 2 }
  0x66   :  { %2077 = vmatpush1.bf16.msra.mxu1 %v2872_v31  ;;  %v2909_v31 = vld [vmem:[#allocation6 + $0x570] ss:$24 sps:$4 sm:$0xff]  }
  0x67   :  { %2118 = vmatpush1.bf16.msra.mxu0 %v2873_v32  ;;  %2078 = vmatprep.subr.bf16.mxu1 %v2874_v33  ;;  %v101_v32 = vadd.f32 %v100_v22, %v99_v12  ;;  %v107_v33 = vadd.f32 %v106_v23, %v105_v13  ;;  %v2924_v12 = vld [vmem:[#allocation6 + $0x604] ss:$24 sps:$4 sm:$0xff]  }
  0x68   :  { %2119 = vmatprep.subr.bf16.mxu0 %v2876_v34  ;;  %v142_v34 = vrot.slane %v141_v24, 2  ;;  %v2927_v13 = vld [vmem:[#allocation6 + $0xc] ss:$24 sps:$4 sm:$0xff]  }
  0x69   :  { %v102_v42 = vrot.slane %v101_v32, 1 }
  0x6a   :  { %2079 = vmatpush1.bf16.msra.mxu1 %v2878_v35  ;;  %v148_v35 = vrot.slane %v147_v25, 2 }
  0x6b   :  { %2120 = vmatpush1.bf16.msra.mxu0 %v2879_v36  ;;  %2080 = vmatprep.subr.bf16.mxu1 %v2880_v37  ;;  %v2910_v36 = vld [vmem:[#allocation6 + $0x2a4] ss:$24 sps:$4 sm:$0xff]   ;;  %v113_v37 = vadd.f32 %v112_v26, %v111_v18 }
  0x6c   :  { %2121 = vmatprep.subr.bf16.mxu0 %v2882_v38  ;;  %v119_v38 = vadd.f32 %v118_v27, %v117_v19 }
  0x6e   :  { %2081 = vmatpush1.bf16.msra.mxu1 %v2884_v39  ;;  %v137_v39 = vadd.f32 %v136_v28, %v135_v20 }
  0x6f   :  { %2122 = vmatpush1.bf16.msra.mxu0 %v2885_v43  ;;  %2082 = vmatprep.subr.bf16.mxu1 %v2886_v44  ;;  %v108_v43 = vrot.slane %v107_v33, 1  ;;  %v143_v44 = vadd.f32 %v142_v34, %v141_v24  ;;  %v2930_v34 = vld [vmem:[#allocation6 + $0x634] ss:$24 sps:$4 sm:$0xff]  }
  0x70   :  { %2123 = vmatprep.subr.bf16.mxu0 %v2888_v45  ;;  %v149_v45 = vadd.f32 %v148_v35, %v147_v25  ;;  %v138_v48 = vrot.slane %v137_v39, 1  ;;  %v2931_v35 = vld [vmem:[#allocation6 + $0x38] ss:$24 sps:$4 sm:$0xff]  }
  0x72   :  { %2083 = vmatpush1.bf16.msra.mxu1 %v2890_v46  ;;  %v114_v46 = vrot.slane %v113_v37, 1  ;;  %v150_v54 = vrot.slane %v149_v45, 1  ;;  %v139_v59 = vadd.f32 %v138_v48, %v137_v39  ;;  %v2937_v39 = vld [vmem:[#allocation6 + $0x68] ss:$24 sps:$4 sm:$0xff]  }
  0x73   :  { %2124 = vmatpush1.bf16.msra.mxu0 %v2891_v47  ;;  %2084 = vmatprep.subr.bf16.mxu1 %v2892_v50  ;;  %v120_v47 = vrot.slane %v119_v38, 1  ;;  %v155_v50 = vadd.f32 %v154_v40, %v153_v29  ;;  %v2925_v29 = vld [vmem:[#allocation6 + $0x8] ss:$24 sps:$4 sm:$0xff]   ;;  %v2945_v40 = vld [vmem:[#allocation6 + $0x9c] ss:$24 sps:$4 sm:$0xff]  }
  0x74   :  { %2125 = vmatprep.subr.bf16.mxu0 %v2894_v51  ;;  %v103_v51 = vadd.f32 %v102_v42, %v101_v32  ;;  %v115_v57 = vadd.f32 %v114_v46, %v113_v37  ;;  %v151_v1 = vadd.f32 %v150_v54, %v149_v45  ;;  %v2928_v37 = vld [vmem:[#allocation6 + $0x630] ss:$24 sps:$4 sm:$0xff]   ;;  %v2942_v42 = vld [vmem:[#allocation6 + $0x694] ss:$24 sps:$4 sm:$0xff]  }
  0x75   :  { %v121_v58 = vadd.f32 %v120_v47, %v119_v38  ;;  %v2936_v38 = vld [vmem:[#allocation6 + $0x664] ss:$24 sps:$4 sm:$0xff]   ;;  %v2943_v47 = vld [vmem:[#allocation6 + $0x98] ss:$24 sps:$4 sm:$0xff]  }
  0x76   :  { %2085 = vmatpush1.bf16.msra.mxu1 %v2896_v52  ;;  %v109_v52 = vadd.f32 %v108_v43, %v107_v33  ;;  %v2922_v33 = vld [vmem:[#allocation6 + $0x600] ss:$24 sps:$4 sm:$0xff]   ;;  %v2940_v54 = vld [vmem:[#allocation6 + $0x690] ss:$24 sps:$4 sm:$0xff]  }
  0x77   :  { %2126 = vmatpush1.bf16.msra.mxu0 %v2897_v53  ;;  %2086 = vmatprep.subr.bf16.mxu1 %v2898_v61  ;;  %v144_v53 = vrot.slane %v143_v44, 1  ;;  %v156_v61 = vrot.slane %v155_v50, 1  ;;  %v183_v4 = vcombine.low %v115_v57, %v121_v58  ;;  %v82_v43 = vld [vmem:[#allocation4 + $0x10] sm:$0xff] }
  0x78   :  { %2127 = vmatprep.subr.bf16.mxu0 %v2900_v2  ;;  %v182_v2 = vcombine.low %v103_v51, %v109_v52  ;;  %v90_v45 = vunpack.c.l.bf16 %v82_v43  ;;  %v91_v46 = vunpack.c.h.bf16 %v82_v43  ;;  %v2951_v51 = vld [vmem:[#allocation6 + $0xcc] ss:$24 sps:$4 sm:$0xff]  }
  0x79   :  { %v145_v0 = vadd.f32 %v144_v53, %v143_v44  ;;  %v157_v3 = vadd.f32 %v156_v61, %v155_v50  ;;  %v197_v9 = vrot.slane %v183_v4, %v3460_v60  ;;  %v85_v44 = vld [vmem:[#allocation4 + $0x28] sm:$0xff]  ;;  %v2949_v61 = vld [vmem:[#allocation6 + $0xc8] ss:$24 sps:$4 sm:$0xff]   ;;  %v79_v43 = vld [vmem:[#allocation2 + $0x8] sm:$0xf] }
  0x7a   :  { %2087 = vmatpush1.bf16.msra.mxu1 %v2902_v11  ;;  %v190_v8 = vrot.slane %v182_v2, %v3460_v60  ;;  %v96_v48 = vunpack.c.l.bf16 %v85_v44  ;;  %v97_v50 = vunpack.c.h.bf16 %v85_v44  ;;  %v122_v52 = vrot.slane %v90_v45, 4  ;;  %v2948_v57 = vld [vmem:[#allocation6 + $0x6c4] ss:$24 sps:$4 sm:$0xff]  }
  0x7b   :  { %2128 = vmatpush1.bf16.msra.mxu0 %v2903_v16  ;;  %2088 = vmatprep.subr.bf16.mxu1 %v2904_v17  ;;  %v207_v6 = vcombine.low %v139_v59, %v145_v0  ;;  %v208_v10 = vcombine.low %v151_v1, %v157_v3  ;;  %v128_v53 = vrot.slane %v91_v46, 4  ;;  %v2957_v0 = vld [vmem:[#allocation6 + $0xfc] ss:$24 sps:$4 sm:$0xff]   ;;  %v2946_v3 = vld [vmem:[#allocation6 + $0x6c0] ss:$24 sps:$4 sm:$0xff]  }
  0x7c   :  { %2129 = vmatprep.subr.bf16.mxu0 %v2906_v21  ;;  %v198_v15 = vcombine.low %v190_v8, %v197_v9  ;;  %v123_v58 = vadd.f32 %v122_v52, %v90_v45  ;;  %v2955_v9 = vld [vmem:[#allocation6 + $0xf8] ss:$24 sps:$4 sm:$0xff]  }
  0x7d   :  { %v215_v11 = vrot.slane %v207_v6, %v3460_v60  ;;  %v222_v14 = vrot.slane %v208_v10, %v3460_v60  ;;  %v129_v59 = vadd.f32 %v128_v53, %v91_v46  ;;  %v2954_v6 = vld [vmem:[#allocation6 + $0x6f4] ss:$24 sps:$4 sm:$0xff]   ;;  %v2970_v45 = vld [vmem:[#allocation6 + $0x780] ss:$24 sps:$4 sm:$0xff]   ;;  %v2976_v52 = vld [vmem:[#allocation6 + $0x7b0] ss:$24 sps:$4 sm:$0xff]  }
  0x7e   :  { %2089 = vmatpush1.bf16.msra.mxu1 %v2908_v30  ;;  %v124_v1 = vrot.slane %v123_v58, 2  ;;  %v2978_v46 = vld [vmem:[#allocation6 + $0x7b4] ss:$24 sps:$4 sm:$0xff]   ;;  %v2984_v53 = vld [vmem:[#allocation6 + $0x7e4] ss:$24 sps:$4 sm:$0xff]  }
  0x7f   :  { %2130 = vmatpush1.bf16.msra.mxu0 %v2909_v31  ;;  %2090 = vmatprep.subr.bf16.mxu1 %v2910_v36  ;;  %v223_v16 = vcombine.low %v215_v11, %v222_v14  ;;  %v2933_v31 = vld [vmem:[#allocation6 + $0x3c] ss:$24 sps:$4 sm:$0xff]   ;;  %v2939_v36 = vld [vmem:[#allocation6 + $0x6c] ss:$24 sps:$4 sm:$0xff]   ;;  %v130_v2 = vrot.slane %v129_v59, 2 }
  0x80   :  { %2131 = vmatprep.subr.bf16.mxu0 %v2912_v41  ;;  %v2934_v41 = vld [vmem:[#allocation6 + $0x660] ss:$24 sps:$4 sm:$0xff]  }
  0x81   :  { %v236_v17 = vrot.slane %v223_v16, 7  ;;  %v131_v8 = vadd.f32 %v130_v2, %v129_v59  ;;  %v2999_v59 = vld [vmem:[#allocation6 + $0x24c] ss:$24 sps:$4 sm:$0xff]  }
  0x82   :  { %2091 = vmatpush1.bf16.msra.mxu1 %v2914_v55  ;;  %v158_v55 = vrot.slane %v96_v48, 4 }
  0x83   :  { %2132 = vmatpush1.bf16.msra.mxu0 %v2915_v56  ;;  %2092 = vmatprep.subr.bf16.mxu1 %v2916_v62  ;;  %v238_v18 = vsel %vm237_vm0, %v236_v17, %v198_v15  ;;  %v164_v56 = vrot.slane %v97_v50, 4  ;;  %v132_v14 = vrot.slane %v131_v8, 1  ;;  %v2952_v15 = vld [vmem:[#allocation6 + $0x6f0] ss:$24 sps:$4 sm:$0xff]  }
  0x84   :  { %2133 = vmatprep.subr.bf16.mxu0 %v2918_v63  ;;  %v240_v19 = vsel %vm239_vm1, %v236_v17, %v238_v18  ;;  %v159_v62 = vadd.f32 %v158_v55, %v96_v48  ;;  %v2960_v18 = vld [vmem:[#allocation6 + $0x724] ss:$24 sps:$4 sm:$0xff]   ;;  %v2979_v48 = vld [vmem:[#allocation6 + $0x1b8] ss:$24 sps:$4 sm:$0xff]  }
  0x85   :  { %v242_v20 = vsel %vm241_vm2, %v236_v17, %v240_v19  ;;  %v165_v63 = vadd.f32 %v164_v56, %v97_v50  ;;  %v2993_v55 = vld [vmem:[#allocation6 + $0x21c] ss:$24 sps:$4 sm:$0xff]   ;;  %v2982_v56 = vld [vmem:[#allocation6 + $0x7e0] ss:$24 sps:$4 sm:$0xff]  }
  0x86   :  { %2093 = vmatpush1.bf16.msra.mxu1 %v2920_v5  ;;  %v244_v21 = vsel %vm243_vm3, %v236_v17, %v242_v20  ;;  %v160_v4 = vrot.slane %v159_v62, 2  ;;  %v133_v20 = vadd.f32 %v132_v14, %v131_v8  ;;  %v3000_v8 = vld [vmem:[#allocation6 + $0x870] ss:$24 sps:$4 sm:$0xff]  }
  0x87   :  { %2134 = vmatpush1.bf16.msra.mxu0 %v2921_v7  ;;  %2185 = vmatprep.subr.bf16.mxu1 %v2927_v13  ;;  %v272_v22 = vrot.slane %v244_v21, %v3460_v60  ;;  %v265_v23 = vcombine.high %v244_v21, %v244_v21  ;;  %v166_v5 = vrot.slane %v165_v63, 2  ;;  %v125_v7 = vadd.f32 %v124_v1, %v123_v58  ;;  %v2961_v21 = vld [vmem:[#allocation6 + $0x128] ss:$24 sps:$4 sm:$0xff]   ;;  %v2991_v58 = vld [vmem:[#allocation6 + $0x218] ss:$24 sps:$4 sm:$0xff]  }
  0x88   :  { %2144 = vmatprep.subr.bf16.mxu0 %v2924_v12  ;;  %v161_v10 = vadd.f32 %v160_v4, %v159_v62  ;;  %v2963_v12 = vld [vmem:[#allocation6 + $0x12c] ss:$24 sps:$4 sm:$0xff]   ;;  %v2988_v62 = vld [vmem:[#allocation6 + $0x810] ss:$24 sps:$4 sm:$0xff]   ;;  %v2994_v4 = vld [vmem:[#allocation6 + $0x840] ss:$24 sps:$4 sm:$0xff]  }
  0x89   :  { %v280_v24 = vcombine.high %v272_v22, %v272_v22  ;;  %v279_v25 = vrot.slane %v265_v23, %v3460_v60  ;;  %v3472_v26 = vpack.c.bf16 %v272_v22, %v272_v22  ;;  %v167_v11 = vadd.f32 %v166_v5, %v165_v63  ;;  %v2997_v1 = vld [vmem:[#allocation6 + $0x248] ss:$24 sps:$4 sm:$0xff]   ;;  %v3002_v5 = vld [vmem:[#allocation6 + $0x874] ss:$24 sps:$4 sm:$0xff]   ;;  %v3015_v14 = vld [vmem:[#allocation6 + $0x2d8] ss:$24 sps:$4 sm:$0xff]  }
  0x8a   :  { %v126_v13 = vrot.slane %v125_v7, 1  ;;  %v162_v16 = vrot.slane %v161_v10, 1 }
  0x8b   :  { %v3474_v27 = vpack.c.bf16 %v280_v24, %v280_v24  ;;  %v281_v28 = vcombine.high %v279_v25, %v279_v25  ;;  %v3476_v30 = vpack.c.bf16 %v279_v25, %v279_v25  ;;  %v168_v17 = vrot.slane %v167_v11, 1  ;;  %v2969_v24 = vld [vmem:[#allocation6 + $0x15c] ss:$24 sps:$4 sm:$0xff]  }
  0x8c   :  { %v127_v19 = vadd.f32 %v126_v13, %v125_v7  ;;  %v163_v22 = vadd.f32 %v162_v16, %v161_v10  ;;  %v3011_v7 = vld [vmem:[#allocation6 + $0x2ac] ss:$24 sps:$4 sm:$0xff]   ;;  %v3009_v10 = vld [vmem:[#allocation6 + $0x2a8] ss:$24 sps:$4 sm:$0xff]  }
  0x8d   :  { %2094 = vmatprep.mubr.bf16.mxu1 %v3474_v27  ;;  %v3479_v32 = vpack.c.bf16 %v281_v28, %v281_v28  ;;  %v169_v23 = vadd.f32 %v168_v17, %v167_v11  ;;  %v2958_v28 = vld [vmem:[#allocation6 + $0x720] ss:$24 sps:$4 sm:$0xff]   ;;  %v3017_v11 = vld [vmem:[#allocation6 + $0x2dc] ss:$24 sps:$4 sm:$0xff]   ;;  %v3012_v16 = vld [vmem:[#allocation6 + $0x8d0] ss:$24 sps:$4 sm:$0xff]  }
  0x8e   :  { %2095 = vmatmul.mubr.bf16.vlgmr.msra.gmra.mrb[0].mxu1 %v3472_v26  ;;  %v199_v25 = vcombine.low %v127_v19, %v133_v20  ;;  %v3014_v13 = vld [vmem:[#allocation6 + $0x8d4] ss:$24 sps:$4 sm:$0xff]  }
  0x8f   :  { %2135 = vmatprep.mubr.bf16.mxu0 %v3479_v32  ;;  %2186 = vmatpush1.bf16.msra.mxu1 %v2925_v29  ;;  %v224_v29 = vcombine.low %v163_v22, %v169_v23  ;;  %v3023_v17 = vld [vmem:[#allocation6 + $0x14] ss:$24 sps:$4 sm:$0xff]   ;;  %v3029_v22 = vld [vmem:[#allocation6 + $0x44] ss:$24 sps:$4 sm:$0xff]   ;;  %v3024_v23 = vld [vmem:[#allocation6 + $0x338] ss:$24 sps:$4 sm:$0xff]  }
  0x90   :  { %2136 = vmatmul.mubr.bf16.vlgmr.msra.gmra.mrb[0].mxu0 %v3476_v30  ;;  %2187 = vmatprep.subr.bf16.mxu1 %v2933_v31  ;;  %v2966_v31 = vld [vmem:[#allocation6 + $0x754] ss:$24 sps:$4 sm:$0xff]  }
  0x91   :  { %2145 = vmatpush1.bf16.msra.mxu0 %v2922_v33  ;;  %2217 = vmatprep.mubr.bf16.mxu1 %v3474_v27  ;;  %v2967_v33 = vld [vmem:[#allocation6 + $0x158] ss:$24 sps:$4 sm:$0xff]   ;;  %v3026_v20 = vld [vmem:[#allocation6 + $0x33c] ss:$24 sps:$4 sm:$0xff]  }
  0x92   :  { %2146 = vmatprep.subr.bf16.mxu0 %v2930_v34  ;;  %v206_v34 = vrot.slane %v199_v25, %v3460_v60  ;;  %v3027_v25 = vld [vmem:[#allocation6 + $0x40] ss:$24 sps:$4 sm:$0xff]  }
  0x93   :  { %2188 = vmatpush1.bf16.msra.mxu1 %v2931_v35  ;;  %v231_v35 = vrot.slane %v224_v29, %v3460_v60  ;;  %v3030_v29 = vld [vmem:[#allocation6 + $0x368] ss:$24 sps:$4 sm:$0xff]  }
  0x94   :  { %2189 = vmatprep.subr.bf16.mxu1 %v2939_v36  ;;  %v2975_v36 = vld [vmem:[#allocation6 + $0x18c] ss:$24 sps:$4 sm:$0xff]  }
  0x95   :  { %2147 = vmatpush1.bf16.msra.mxu0 %v2928_v37  ;;  %v2964_v37 = vld [vmem:[#allocation6 + $0x750] ss:$24 sps:$4 sm:$0xff]  }
  0x96   :  { %2148 = vmatprep.subr.bf16.mxu0 %v2936_v38  ;;  %v247_v38 = vrot.slane %v231_v35, 7  ;;  %v3036_v35 = vld [vmem:[#allocation6 + $0x398] ss:$24 sps:$4 sm:$0xff]  }
  0x97   :  { %2190 = vmatpush1.bf16.msra.mxu1 %v2937_v39  ;;  %v2972_v39 = vld [vmem:[#allocation6 + $0x784] ss:$24 sps:$4 sm:$0xff]  }
  0x98   :  { %2191 = vmatprep.subr.bf16.mxu1 %v2945_v40  ;;  %v2973_v40 = vld [vmem:[#allocation6 + $0x188] ss:$24 sps:$4 sm:$0xff]  }
  0x99   :  { %2149 = vmatpush1.bf16.msra.mxu0 %v2934_v41  ;;  %v248_v41 = vsel %vm237_vm0, %v247_v38, %v206_v34  ;;  %v3041_v34 = vld [vmem:[#allocation6 + $0xa4] ss:$24 sps:$4 sm:$0xff]  }
  0x9a   :  { %2150 = vmatprep.subr.bf16.mxu0 %v2942_v42  ;;  %v2981_v42 = vld [vmem:[#allocation6 + $0x1bc] ss:$24 sps:$4 sm:$0xff]   ;;  %v249_v44 = vsel %vm239_vm1, %v247_v38, %v248_v41 }
  0x9b   :  { %2192 = vmatpush1.bf16.msra.mxu1 %v2943_v47  ;;  %v250_v60 = vsel %vm241_vm2, %v247_v38, %v249_v44  ;;  %v3053_v41 = vld [vmem:[#allocation6 + $0x104] ss:$24 sps:$4 sm:$0xff]   ;;  %v3051_v44 = vld [vmem:[#allocation6 + $0x100] ss:$24 sps:$4 sm:$0xff]  }
  0x9c   :  { %2193 = vmatprep.subr.bf16.mxu1 %v2951_v51  ;;  %v251_v47 = vsel %vm243_vm3, %v247_v38, %v250_v60  ;;  %v2987_v51 = vld [vmem:[#allocation6 + $0x1ec] ss:$24 sps:$4 sm:$0xff]   ;;  %v3054_v60 = vld [vmem:[#allocation6 + $0x428] ss:$24 sps:$4 sm:$0xff]  }
  0x9d   :  { %2151 = vmatpush1.bf16.msra.mxu0 %v2940_v54  ;;  %v255_v50 = vadd.f32 %v251_v47, %v79_v43  ;;  %v2985_v54 = vld [vmem:[#allocation6 + $0x1e8] ss:$24 sps:$4 sm:$0xff]   ;;  %v3047_v38 = vld [vmem:[#allocation6 + $0xd4] ss:$24 sps:$4 sm:$0xff]  }
  0x9e   :  { %2152 = vmatprep.subr.bf16.mxu0 %v2948_v57  ;;  %v2990_v57 = vld [vmem:[#allocation6 + $0x814] ss:$24 sps:$4 sm:$0xff]   ;;  %v3057_v47 = vld [vmem:[#allocation6 + $0x130] ss:$24 sps:$4 sm:$0xff]  }
  0x9f   :  { %2194 = vmatpush1.bf16.msra.mxu1 %v2949_v61  ;;  %257 = vst [vmem:[#allocation2 + $0x8] sm:$0xf] %v255_v50  ;;  %v3056_v43 = vld [vmem:[#allocation6 + $0x42c] ss:$24 sps:$4 sm:$0xff]   ;;  %v3060_v50 = vld [vmem:[#allocation6 + $0x458] ss:$24 sps:$4 sm:$0xff]  }
  0xa0   :  { %2195 = vmatprep.subr.bf16.mxu1 %v2957_v0  ;;  %v2996_v0 = vld [vmem:[#allocation6 + $0x844] ss:$24 sps:$4 sm:$0xff]  }
  0xa1   :  { %2153 = vmatpush1.bf16.msra.mxu0 %v2946_v3  ;;  %v3005_v3 = vld [vmem:[#allocation6 + $0x27c] ss:$24 sps:$4 sm:$0xff]  }
  0xa2   :  { %2154 = vmatprep.subr.bf16.mxu0 %v2954_v6  ;;  %v3003_v6 = vld [vmem:[#allocation6 + $0x278] ss:$24 sps:$4 sm:$0xff]  }
  0xa3   :  { %2196 = vmatpush1.bf16.msra.mxu1 %v2955_v9  ;;  %v3008_v9 = vld [vmem:[#allocation6 + $0x8a4] ss:$24 sps:$4 sm:$0xff]  }
  0xa4   :  { %2197 = vmatprep.subr.bf16.mxu1 %v2963_v12  ;;  %v3006_v12 = vld [vmem:[#allocation6 + $0x8a0] ss:$24 sps:$4 sm:$0xff]  }
  0xa5   :  { %2155 = vmatpush1.bf16.msra.mxu0 %v2952_v15  ;;  %v3020_v15 = vld [vmem:[#allocation6 + $0x30c] ss:$24 sps:$4 sm:$0xff]  }
  0xa6   :  { %2156 = vmatprep.subr.bf16.mxu0 %v2960_v18  ;;  %v2501_v61 = vld.sshfl [vmem:[#allocation2 + $0x8] sm:$0x33 pattern:$0x76325410]  ;;  %v3018_v18 = vld [vmem:[#allocation6 + $0x308] ss:$24 sps:$4 sm:$0xff]  }
  0xa7   :  { %2198 = vmatpush1.bf16.msra.mxu1 %v2961_v21  ;;  %v289_v63 = vcombine.high %v2501_v61, %v2501_v61  ;;  %v3494_v19 = vpack.c.bf16 %v2501_v61, %v2501_v61  ;;  %v3021_v21 = vld [vmem:[#allocation6 + $0x10] ss:$24 sps:$4 sm:$0xff]   ;;  %v3075_v61 = vld [vmem:[#allocation6 + $0x1c0] ss:$24 sps:$4 sm:$0xff]  }
  0xa8   :  { %2199 = vmatprep.subr.bf16.mxu1 %v2969_v24  ;;  %v3032_v24 = vld [vmem:[#allocation6 + $0x36c] ss:$24 sps:$4 sm:$0xff]  }
  0xa9   :  { %2157 = vmatpush1.bf16.msra.mxu0 %v2958_v28  ;;  %v3491_v2 = vpack.c.bf16 %v289_v63, %v289_v63  ;;  %v3035_v28 = vld [vmem:[#allocation6 + $0x74] ss:$24 sps:$4 sm:$0xff]   ;;  %v3078_v63 = vld [vmem:[#allocation6 + $0x4e8] ss:$24 sps:$4 sm:$0xff]  }
  0xaa   :  { %2158 = vmatprep.subr.bf16.mxu0 %v2966_v31  ;;  %v3038_v31 = vld [vmem:[#allocation6 + $0x39c] ss:$24 sps:$4 sm:$0xff]  }
  0xab   :  { %2200 = vmatpush1.bf16.msra.mxu1 %v2967_v33  ;;  %2176 = vmatprep.mubr.bf16.mxu0 %v3491_v2  ;;  %v3033_v33 = vld [vmem:[#allocation6 + $0x70] ss:$24 sps:$4 sm:$0xff]  }
  0xac   :  { %2201 = vmatprep.subr.bf16.mxu1 %v2975_v36  ;;  %v3044_v36 = vld [vmem:[#allocation6 + $0x3cc] ss:$24 sps:$4 sm:$0xff]  }
  0xad   :  { %2159 = vmatpush1.bf16.msra.mxu0 %v2964_v37  ;;  %v3039_v37 = vld [vmem:[#allocation6 + $0xa0] ss:$24 sps:$4 sm:$0xff]  }
  0xae   :  { %2160 = vmatprep.subr.bf16.mxu0 %v2972_v39  ;;  %v3050_v39 = vld [vmem:[#allocation6 + $0x3fc] ss:$24 sps:$4 sm:$0xff]  }
  0xaf   :  { %2202 = vmatpush1.bf16.msra.mxu1 %v2973_v40  ;;  %v3045_v40 = vld [vmem:[#allocation6 + $0xd0] ss:$24 sps:$4 sm:$0xff]  }
  0xb0   :  { %2203 = vmatprep.subr.bf16.mxu1 %v2981_v42  ;;  %v3048_v42 = vld [vmem:[#allocation6 + $0x3f8] ss:$24 sps:$4 sm:$0xff]  }
  0xb1   :  { %2161 = vmatpush1.bf16.msra.mxu0 %v2970_v45  ;;  %v3059_v45 = vld [vmem:[#allocation6 + $0x134] ss:$24 sps:$4 sm:$0xff]  }
  0xb2   :  { %2162 = vmatprep.subr.bf16.mxu0 %v2978_v46  ;;  %v3062_v46 = vld [vmem:[#allocation6 + $0x45c] ss:$24 sps:$4 sm:$0xff]  }
  0xb3   :  { %2204 = vmatpush1.bf16.msra.mxu1 %v2979_v48  ;;  %v3065_v48 = vld [vmem:[#allocation6 + $0x164] ss:$24 sps:$4 sm:$0xff]  }
  0xb4   :  { %2205 = vmatprep.subr.bf16.mxu1 %v2987_v51  ;;  %v3068_v51 = vld [vmem:[#allocation6 + $0x48c] ss:$24 sps:$4 sm:$0xff]  }
  0xb5   :  { %2163 = vmatpush1.bf16.msra.mxu0 %v2976_v52  ;;  %v3063_v52 = vld [vmem:[#allocation6 + $0x160] ss:$24 sps:$4 sm:$0xff]  }
  0xb6   :  { %2164 = vmatprep.subr.bf16.mxu0 %v2984_v53  ;;  %v3071_v53 = vld [vmem:[#allocation6 + $0x194] ss:$24 sps:$4 sm:$0xff]  }
  0xb7   :  { %2206 = vmatpush1.bf16.msra.mxu1 %v2985_v54  ;;  %v3066_v54 = vld [vmem:[#allocation6 + $0x488] ss:$24 sps:$4 sm:$0xff]  }
  0xb8   :  { %2207 = vmatprep.subr.bf16.mxu1 %v2993_v55  ;;  %v3074_v55 = vld [vmem:[#allocation6 + $0x4bc] ss:$24 sps:$4 sm:$0xff]  }
  0xb9   :  { %2165 = vmatpush1.bf16.msra.mxu0 %v2982_v56  ;;  %v3069_v56 = vld [vmem:[#allocation6 + $0x190] ss:$24 sps:$4 sm:$0xff]  }
  0xba   :  { %2166 = vmatprep.subr.bf16.mxu0 %v2990_v57  ;;  %v3077_v57 = vld [vmem:[#allocation6 + $0x1c4] ss:$24 sps:$4 sm:$0xff]  }
  0xbb   :  { %2208 = vmatpush1.bf16.msra.mxu1 %v2991_v58  ;;  %v3072_v58 = vld [vmem:[#allocation6 + $0x4b8] ss:$24 sps:$4 sm:$0xff]  }
  0xbc   :  { %2209 = vmatprep.subr.bf16.mxu1 %v2999_v59  ;;  %v3080_v59 = vld [vmem:[#allocation6 + $0x4ec] ss:$24 sps:$4 sm:$0xff]  }
  0xbd   :  { %2167 = vmatpush1.bf16.msra.mxu0 %v2988_v62  ;;  %v3083_v62 = vld [vmem:[#allocation6 + $0x1f4] ss:$24 sps:$4 sm:$0xff]  }
  0xbe   :  { %2168 = vmatprep.subr.bf16.mxu0 %v2996_v0  ;;  %v3086_v0 = vld [vmem:[#allocation6 + $0x51c] ss:$24 sps:$4 sm:$0xff]  }
  0xbf   :  { %2210 = vmatpush1.bf16.msra.mxu1 %v2997_v1  ;;  %v3081_v1 = vld [vmem:[#allocation6 + $0x1f0] ss:$24 sps:$4 sm:$0xff]  }
  0xc0   :  { %2211 = vmatprep.subr.bf16.mxu1 %v3005_v3  ;;  %v3089_v3 = vld [vmem:[#allocation6 + $0x224] ss:$24 sps:$4 sm:$0xff]  }
  0xc1   :  { %2169 = vmatpush1.bf16.msra.mxu0 %v2994_v4  ;;  %v3084_v4 = vld [vmem:[#allocation6 + $0x518] ss:$24 sps:$4 sm:$0xff]  }
  0xc2   :  { %2170 = vmatprep.subr.bf16.mxu0 %v3002_v5  ;;  %v3092_v5 = vld [vmem:[#allocation6 + $0x54c] ss:$24 sps:$4 sm:$0xff]  }
  0xc3   :  { %2212 = vmatpush1.bf16.msra.mxu1 %v3003_v6  ;;  %v3087_v6 = vld [vmem:[#allocation6 + $0x220] ss:$24 sps:$4 sm:$0xff]  }
  0xc4   :  { %2213 = vmatprep.subr.bf16.mxu1 %v3011_v7  ;;  %v3095_v7 = vld [vmem:[#allocation6 + $0x254] ss:$24 sps:$4 sm:$0xff]  }
  0xc5   :  { %2171 = vmatpush1.bf16.msra.mxu0 %v3000_v8  ;;  %v3090_v8 = vld [vmem:[#allocation6 + $0x548] ss:$24 sps:$4 sm:$0xff]  }
  0xc6   :  { %2172 = vmatprep.subr.bf16.mxu0 %v3008_v9  ;;  %v3098_v9 = vld [vmem:[#allocation6 + $0x57c] ss:$24 sps:$4 sm:$0xff]  }
  0xc7   :  { %2214 = vmatpush1.bf16.msra.mxu1 %v3009_v10  ;;  %v3093_v10 = vld [vmem:[#allocation6 + $0x250] ss:$24 sps:$4 sm:$0xff]  }
  0xc8   :  { %2215 = vmatprep.subr.bf16.mxu1 %v3017_v11  ;;  %v3101_v11 = vld [vmem:[#allocation6 + $0x284] ss:$24 sps:$4 sm:$0xff]  }
  0xc9   :  { %2173 = vmatpush1.bf16.msra.mxu0 %v3006_v12  ;;  %v3096_v12 = vld [vmem:[#allocation6 + $0x578] ss:$24 sps:$4 sm:$0xff]  }
  0xca   :  { %2174 = vmatprep.subr.bf16.mxu0 %v3014_v13  ;;  %v3104_v13 = vld [vmem:[#allocation6 + $0x5ac] ss:$24 sps:$4 sm:$0xff]  }
  0xcb   :  { %2216 = vmatpush1.bf16.msra.mxu1 %v3015_v14  ;;  %v3099_v14 = vld [vmem:[#allocation6 + $0x280] ss:$24 sps:$4 sm:$0xff]  }
  0xcc   :  { %2226 = vmatprep.subr.bf16.mxu1 %v3020_v15  ;;  %v3107_v15 = vld [vmem:[#allocation6 + $0x2b4] ss:$24 sps:$4 sm:$0xff]  }
  0xcd   :  { %2175 = vmatpush1.bf16.msra.mxu0 %v3012_v16  ;;  %v3102_v16 = vld [vmem:[#allocation6 + $0x5a8] ss:$24 sps:$4 sm:$0xff]  }
  0xce   :  { %2308 = vmatprep.subr.bf16.mxu0 %v3023_v17  ;;  %2218 = vmatmul.mubr.bf16.vlgmr.msra.gmra.mrb[4].mxu1 %v3472_v26  ;;  %v3110_v17 = vld [vmem:[#allocation6 + $0x5dc] ss:$24 sps:$4 sm:$0xff]  }
  0xcf   :  { %2227 = vmatpush1.bf16.msra.mxu1 %v3018_v18  ;;  %2258 = vmatprep.mubr.bf16.mxu1 %v3479_v32  ;;  %v3105_v18 = vld [vmem:[#allocation6 + $0x2b0] ss:$24 sps:$4 sm:$0xff]  }
  0xd0   :  { %2177 = vmatmul.mubr.bf16.vlgmr.msra.gmra.mrb[0].mxu0 %v3494_v19  ;;  %2228 = vmatprep.subr.bf16.mxu1 %v3026_v20  ;;  %v3113_v20 = vld [vmem:[#allocation6 + $0x2e4] ss:$24 sps:$4 sm:$0xff]  }
  0xd1   :  { %2309 = vmatpush1.bf16.msra.mxu0 %v3021_v21  ;;  %2340 = vmatprep.mubr.bf16.mxu0 %v3474_v27  ;;  %v3042_v27 = vld [vmem:[#allocation6 + $0x3c8] ss:$24 sps:$4 sm:$0xff]   ;;  %v3108_v21 = vld [vmem:[#allocation6 + $0x5d8] ss:$24 sps:$4 sm:$0xff]  }
  0xd2   :  { %2310 = vmatprep.subr.bf16.mxu0 %v3029_v22  ;;  %v3116_v22 = vld [vmem:[#allocation6 + $0x60c] ss:$24 sps:$4 sm:$0xff]  }
  0xd3   :  { %2229 = vmatpush1.bf16.msra.mxu1 %v3024_v23  ;;  %v3111_v23 = vld [vmem:[#allocation6 + $0x2e0] ss:$24 sps:$4 sm:$0xff]  }
  0xd4   :  { %2230 = vmatprep.subr.bf16.mxu1 %v3032_v24  ;;  %v3119_v24 = vld [vmem:[#allocation6 + $0x314] ss:$24 sps:$4 sm:$0xff]  }
  0xd5   :  { %2311 = vmatpush1.bf16.msra.mxu0 %v3027_v25  ;;  %v3114_v25 = vld [vmem:[#allocation6 + $0x608] ss:$24 sps:$4 sm:$0xff]  }
  0xd6   :  { %2312 = vmatprep.subr.bf16.mxu0 %v3035_v28  ;;  %v3122_v28 = vld [vmem:[#allocation6 + $0x63c] ss:$24 sps:$4 sm:$0xff]  }
  0xd7   :  { %2231 = vmatpush1.bf16.msra.mxu1 %v3030_v29  ;;  %v3117_v29 = vld [vmem:[#allocation6 + $0x310] ss:$24 sps:$4 sm:$0xff]  }
  0xd8   :  { %2232 = vmatprep.subr.bf16.mxu1 %v3038_v31  ;;  %v3125_v31 = vld [vmem:[#allocation6 + $0x344] ss:$24 sps:$4 sm:$0xff]  }
  0xd9   :  { %2313 = vmatpush1.bf16.msra.mxu0 %v3033_v33  ;;  %v3120_v33 = vld [vmem:[#allocation6 + $0x638] ss:$24 sps:$4 sm:$0xff]  }
  0xda   :  { %2314 = vmatprep.subr.bf16.mxu0 %v3041_v34  ;;  %v3128_v34 = vld [vmem:[#allocation6 + $0x66c] ss:$24 sps:$4 sm:$0xff]  }
  0xdb   :  { %2233 = vmatpush1.bf16.msra.mxu1 %v3036_v35  ;;  %v3123_v35 = vld [vmem:[#allocation6 + $0x340] ss:$24 sps:$4 sm:$0xff]  }
  0xdc   :  { %2234 = vmatprep.subr.bf16.mxu1 %v3044_v36  ;;  %v3131_v36 = vld [vmem:[#allocation6 + $0x374] ss:$24 sps:$4 sm:$0xff]  }
  0xdd   :  { %2315 = vmatpush1.bf16.msra.mxu0 %v3039_v37  ;;  %v3126_v37 = vld [vmem:[#allocation6 + $0x668] ss:$24 sps:$4 sm:$0xff]  }
  0xde   :  { %2316 = vmatprep.subr.bf16.mxu0 %v3047_v38  ;;  %v3134_v38 = vld [vmem:[#allocation6 + $0x69c] ss:$24 sps:$4 sm:$0xff]  }
  0xdf   :  { %2235 = vmatpush1.bf16.msra.mxu1 %v3042_v27  ;;  %v3129_v27 = vld [vmem:[#allocation6 + $0x370] ss:$24 sps:$4 sm:$0xff]  }
  0xe0   :  { %2236 = vmatprep.subr.bf16.mxu1 %v3050_v39  ;;  %v3137_v39 = vld [vmem:[#allocation6 + $0x3a4] ss:$24 sps:$4 sm:$0xff]  }
  0xe1   :  { %2317 = vmatpush1.bf16.msra.mxu0 %v3045_v40  ;;  %v3132_v40 = vld [vmem:[#allocation6 + $0x698] ss:$24 sps:$4 sm:$0xff]  }
  0xe2   :  { %2318 = vmatprep.subr.bf16.mxu0 %v3053_v41  ;;  %v3135_v41 = vld [vmem:[#allocation6 + $0x3a0] ss:$24 sps:$4 sm:$0xff]  }
  0xe3   :  { %2237 = vmatpush1.bf16.msra.mxu1 %v3048_v42  ;;  %v3143_v42 = vld [vmem:[#allocation6 + $0x3d4] ss:$24 sps:$4 sm:$0xff]  }
  0xe4   :  { %2238 = vmatprep.subr.bf16.mxu1 %v3056_v43  ;;  %v3146_v43 = vld [vmem:[#allocation6 + $0x6fc] ss:$24 sps:$4 sm:$0xff]  }
  0xe5   :  { %2319 = vmatpush1.bf16.msra.mxu0 %v3051_v44  ;;  %v3141_v44 = vld [vmem:[#allocation6 + $0x3d0] ss:$24 sps:$4 sm:$0xff]  }
  0xe6   :  { %2320 = vmatprep.subr.bf16.mxu0 %v3059_v45  ;;  %v3149_v45 = vld [vmem:[#allocation6 + $0x404] ss:$24 sps:$4 sm:$0xff]  }
  0xe7   :  { %2239 = vmatpush1.bf16.msra.mxu1 %v3054_v60  ;;  %v3144_v60 = vld [vmem:[#allocation6 + $0x6f8] ss:$24 sps:$4 sm:$0xff]  }
  0xe8   :  { %2240 = vmatprep.subr.bf16.mxu1 %v3062_v46  ;;  %v3152_v46 = vld [vmem:[#allocation6 + $0x72c] ss:$24 sps:$4 sm:$0xff]  }
  0xe9   :  { %2321 = vmatpush1.bf16.msra.mxu0 %v3057_v47  ;;  %v3147_v47 = vld [vmem:[#allocation6 + $0x400] ss:$24 sps:$4 sm:$0xff]  }
  0xea   :  { %2322 = vmatprep.subr.bf16.mxu0 %v3065_v48  ;;  %v3155_v48 = vld [vmem:[#allocation6 + $0x434] ss:$24 sps:$4 sm:$0xff]  }
  0xeb   :  { %2241 = vmatpush1.bf16.msra.mxu1 %v3060_v50  ;;  %v3150_v50 = vld [vmem:[#allocation6 + $0x728] ss:$24 sps:$4 sm:$0xff]  }
  0xec   :  { %2242 = vmatprep.subr.bf16.mxu1 %v3068_v51  ;;  %v3158_v51 = vld [vmem:[#allocation6 + $0x75c] ss:$24 sps:$4 sm:$0xff]  }
  0xed   :  { %2323 = vmatpush1.bf16.msra.mxu0 %v3063_v52  ;;  %v3153_v52 = vld [vmem:[#allocation6 + $0x430] ss:$24 sps:$4 sm:$0xff]  }
  0xee   :  { %2324 = vmatprep.subr.bf16.mxu0 %v3071_v53  ;;  %v3161_v53 = vld [vmem:[#allocation6 + $0x464] ss:$24 sps:$4 sm:$0xff]  }
  0xef   :  { %2243 = vmatpush1.bf16.msra.mxu1 %v3066_v54  ;;  %v3156_v54 = vld [vmem:[#allocation6 + $0x758] ss:$24 sps:$4 sm:$0xff]  }
  0xf0   :  { %2244 = vmatprep.subr.bf16.mxu1 %v3074_v55  ;;  %v3164_v55 = vld [vmem:[#allocation6 + $0x78c] ss:$24 sps:$4 sm:$0xff]  }
  0xf1   :  { %2325 = vmatpush1.bf16.msra.mxu0 %v3069_v56  ;;  %v3159_v56 = vld [vmem:[#allocation6 + $0x460] ss:$24 sps:$4 sm:$0xff]  }
  0xf2   :  { %2326 = vmatprep.subr.bf16.mxu0 %v3077_v57  ;;  %v3167_v57 = vld [vmem:[#allocation6 + $0x494] ss:$24 sps:$4 sm:$0xff]  }
  0xf3   :  { %2245 = vmatpush1.bf16.msra.mxu1 %v3072_v58  ;;  %v3162_v58 = vld [vmem:[#allocation6 + $0x788] ss:$24 sps:$4 sm:$0xff]  }
  0xf4   :  { %2246 = vmatprep.subr.bf16.mxu1 %v3080_v59  ;;  %v3170_v59 = vld [vmem:[#allocation6 + $0x7bc] ss:$24 sps:$4 sm:$0xff]  }
  0xf5   :  { %2327 = vmatpush1.bf16.msra.mxu0 %v3075_v61  ;;  %v3165_v61 = vld [vmem:[#allocation6 + $0x490] ss:$24 sps:$4 sm:$0xff]  }
  0xf6   :  { %2328 = vmatprep.subr.bf16.mxu0 %v3083_v62  ;;  %v3173_v62 = vld [vmem:[#allocation6 + $0x4c4] ss:$24 sps:$4 sm:$0xff]  }
  0xf7   :  { %2247 = vmatpush1.bf16.msra.mxu1 %v3078_v63  ;;  %v3168_v63 = vld [vmem:[#allocation6 + $0x7b8] ss:$24 sps:$4 sm:$0xff]  }
  0xf8   :  { %2248 = vmatprep.subr.bf16.mxu1 %v3086_v0  ;;  %v3176_v0 = vld [vmem:[#allocation6 + $0x7ec] ss:$24 sps:$4 sm:$0xff]  }
  0xf9   :  { %2329 = vmatpush1.bf16.msra.mxu0 %v3081_v1  ;;  %v3171_v1 = vld [vmem:[#allocation6 + $0x4c0] ss:$24 sps:$4 sm:$0xff]  }
  0xfa   :  { %2330 = vmatprep.subr.bf16.mxu0 %v3089_v3  ;;  %v3179_v3 = vld [vmem:[#allocation6 + $0x4f4] ss:$24 sps:$4 sm:$0xff]  }
  0xfb   :  { %2249 = vmatpush1.bf16.msra.mxu1 %v3084_v4  ;;  %v3174_v4 = vld [vmem:[#allocation6 + $0x7e8] ss:$24 sps:$4 sm:$0xff]  }
  0xfc   :  { %2250 = vmatprep.subr.bf16.mxu1 %v3092_v5  ;;  %v3182_v5 = vld [vmem:[#allocation6 + $0x81c] ss:$24 sps:$4 sm:$0xff]  }
  0xfd   :  { %2331 = vmatpush1.bf16.msra.mxu0 %v3087_v6  ;;  %v3177_v6 = vld [vmem:[#allocation6 + $0x4f0] ss:$24 sps:$4 sm:$0xff]  }
  0xfe   :  { %2332 = vmatprep.subr.bf16.mxu0 %v3095_v7  ;;  %v3185_v7 = vld [vmem:[#allocation6 + $0x524] ss:$24 sps:$4 sm:$0xff]  }
  0xff   :  { %2251 = vmatpush1.bf16.msra.mxu1 %v3090_v8  ;;  %v3180_v8 = vld [vmem:[#allocation6 + $0x818] ss:$24 sps:$4 sm:$0xff]  }
 0x100   :  { %2252 = vmatprep.subr.bf16.mxu1 %v3098_v9  ;;  %v3188_v9 = vld [vmem:[#allocation6 + $0x84c] ss:$24 sps:$4 sm:$0xff]  }
 0x101   :  { %2333 = vmatpush1.bf16.msra.mxu0 %v3093_v10  ;;  %v3183_v10 = vld [vmem:[#allocation6 + $0x520] ss:$24 sps:$4 sm:$0xff]  }
 0x102   :  { %2334 = vmatprep.subr.bf16.mxu0 %v3101_v11  ;;  %v3191_v11 = vld [vmem:[#allocation6 + $0x554] ss:$24 sps:$4 sm:$0xff]  }
 0x103   :  { %2253 = vmatpush1.bf16.msra.mxu1 %v3096_v12  ;;  %v3186_v12 = vld [vmem:[#allocation6 + $0x848] ss:$24 sps:$4 sm:$0xff]  }
 0x104   :  { %2254 = vmatprep.subr.bf16.mxu1 %v3104_v13  ;;  %v3194_v13 = vld [vmem:[#allocation6 + $0x87c] ss:$24 sps:$4 sm:$0xff]  }
 0x105   :  { %2335 = vmatpush1.bf16.msra.mxu0 %v3099_v14  ;;  %v3189_v14 = vld [vmem:[#allocation6 + $0x550] ss:$24 sps:$4 sm:$0xff]  }
 0x106   :  { %2336 = vmatprep.subr.bf16.mxu0 %v3107_v15  ;;  %v3197_v15 = vld [vmem:[#allocation6 + $0x584] ss:$24 sps:$4 sm:$0xff]  }
 0x107   :  { %2255 = vmatpush1.bf16.msra.mxu1 %v3102_v16  ;;  %v3192_v16 = vld [vmem:[#allocation6 + $0x878] ss:$24 sps:$4 sm:$0xff]  }
 0x108   :  { %2256 = vmatprep.subr.bf16.mxu1 %v3110_v17  ;;  %v3200_v17 = vld [vmem:[#allocation6 + $0x8ac] ss:$24 sps:$4 sm:$0xff]  }
 0x109   :  { %2337 = vmatpush1.bf16.msra.mxu0 %v3105_v18  ;;  %v3195_v18 = vld [vmem:[#allocation6 + $0x580] ss:$24 sps:$4 sm:$0xff]  }
 0x10a   :  { %2338 = vmatprep.subr.bf16.mxu0 %v3113_v20  ;;  %v3203_v20 = vld [vmem:[#allocation6 + $0x5b4] ss:$24 sps:$4 sm:$0xff]  }
 0x10b   :  { %2257 = vmatpush1.bf16.msra.mxu1 %v3108_v21  ;;  %v3198_v21 = vld [vmem:[#allocation6 + $0x8a8] ss:$24 sps:$4 sm:$0xff]  }
 0x10c   :  { %2267 = vmatprep.subr.bf16.mxu1 %v3116_v22  ;;  %v3206_v22 = vld [vmem:[#allocation6 + $0x8dc] ss:$24 sps:$4 sm:$0xff]  }
 0x10d   :  { %2339 = vmatpush1.bf16.msra.mxu0 %v3111_v23  ;;  %v3201_v23 = vld [vmem:[#allocation6 + $0x5b0] ss:$24 sps:$4 sm:$0xff]  }
 0x10e   :  { %2349 = vmatprep.subr.bf16.mxu0 %v3119_v24  ;;  %2259 = vmatmul.mubr.bf16.vlgmr.msra.gmra.mrb[4].mxu1 %v3476_v30  ;;  %v3209_v24 = vld [vmem:[#allocation6 + $0x5e4] ss:$24 sps:$4 sm:$0xff]  }
 0x10f   :  { %2268 = vmatpush1.bf16.msra.mxu1 %v3114_v25  ;;  %2299 = vmatprep.mubr.bf16.mxu1 %v3491_v2  ;;  %v3204_v25 = vld [vmem:[#allocation6 + $0x8d8] ss:$24 sps:$4 sm:$0xff]  }
 0x110   :  { %2341 = vmatmul.mubr.bf16.vlgmr.msra.gmra.mrb[4].mxu0 %v3472_v26  ;;  %2269 = vmatprep.subr.bf16.mxu1 %v3122_v28  ;;  %v3140_v26 = vld [vmem:[#allocation6 + $0x6cc] ss:$24 sps:$4 sm:$0xff]   ;;  %v3207_v28 = vld [vmem:[#allocation6 + $0x5e0] ss:$24 sps:$4 sm:$0xff]  }
 0x111   :  { %2350 = vmatpush1.bf16.msra.mxu0 %v3117_v29  ;;  %2381 = vmatprep.mubr.bf16.mxu0 %v3479_v32  ;;  %v3138_v32 = vld [vmem:[#allocation6 + $0x6c8] ss:$24 sps:$4 sm:$0xff]   ;;  %v3212_v29 = vld [vmem:[#allocation6 + $0x614] ss:$24 sps:$4 sm:$0xff]  }
 0x112   :  { %2351 = vmatprep.subr.bf16.mxu0 %v3125_v31  ;;  %v3210_v31 = vld [vmem:[#allocation6 + $0x610] ss:$24 sps:$4 sm:$0xff]  }
 0x113   :  { %2270 = vmatpush1.bf16.msra.mxu1 %v3120_v33  ;;  %v3215_v33 = vld [vmem:[#allocation6 + $0x644] ss:$24 sps:$4 sm:$0xff]  }
 0x114   :  { %2271 = vmatprep.subr.bf16.mxu1 %v3128_v34  ;;  %v3213_v34 = vld [vmem:[#allocation6 + $0x640] ss:$24 sps:$4 sm:$0xff]  }
 0x115   :  { %2352 = vmatpush1.bf16.msra.mxu0 %v3123_v35  ;;  %v3218_v35 = vld [vmem:[#allocation6 + $0x674] ss:$24 sps:$4 sm:$0xff]  }
 0x116   :  { %2353 = vmatprep.subr.bf16.mxu0 %v3131_v36  ;;  %v3216_v36 = vld [vmem:[#allocation6 + $0x670] ss:$24 sps:$4 sm:$0xff]  }
 0x117   :  { %2272 = vmatpush1.bf16.msra.mxu1 %v3126_v37  ;;  %v3221_v37 = vld [vmem:[#allocation6 + $0x6a4] ss:$24 sps:$4 sm:$0xff]  }
 0x118   :  { %2273 = vmatprep.subr.bf16.mxu1 %v3134_v38  ;;  %v3219_v38 = vld [vmem:[#allocation6 + $0x6a0] ss:$24 sps:$4 sm:$0xff]  }
 0x119   :  { %2354 = vmatpush1.bf16.msra.mxu0 %v3129_v27  ;;  %v3224_v27 = vld [vmem:[#allocation6 + $0x6d4] ss:$24 sps:$4 sm:$0xff]  }
 0x11a   :  { %2355 = vmatprep.subr.bf16.mxu0 %v3137_v39  ;;  %v3222_v39 = vld [vmem:[#allocation6 + $0x6d0] ss:$24 sps:$4 sm:$0xff]  }
 0x11b   :  { %2274 = vmatpush1.bf16.msra.mxu1 %v3132_v40  ;;  %v3227_v40 = vld [vmem:[#allocation6 + $0x704] ss:$24 sps:$4 sm:$0xff]  }
 0x11c   :  { %2275 = vmatprep.subr.bf16.mxu1 %v3140_v26 }
 0x11d   :  { %2356 = vmatpush1.bf16.msra.mxu0 %v3135_v41  ;;  %v3230_v41 = vld [vmem:[#allocation6 + $0x734] ss:$24 sps:$4 sm:$0xff]  }
 0x11e   :  { %2357 = vmatprep.subr.bf16.mxu0 %v3143_v42 }
 0x11f   :  { %2276 = vmatpush1.bf16.msra.mxu1 %v3138_v32 }
 0x120   :  { %2277 = vmatprep.subr.bf16.mxu1 %v3146_v43  ;;  %v3228_v43 = vld [vmem:[#allocation6 + $0x730] ss:$24 sps:$4 sm:$0xff]  }
 0x121   :  { %2358 = vmatpush1.bf16.msra.mxu0 %v3141_v44  ;;  %v3233_v44 = vld [vmem:[#allocation6 + $0x764] ss:$24 sps:$4 sm:$0xff]  }
 0x122   :  { %2359 = vmatprep.subr.bf16.mxu0 %v3149_v45  ;;  %v3231_v45 = vld [vmem:[#allocation6 + $0x760] ss:$24 sps:$4 sm:$0xff]  }
 0x123   :  { %2278 = vmatpush1.bf16.msra.mxu1 %v3144_v60  ;;  %v3236_v60 = vld [vmem:[#allocation6 + $0x794] ss:$24 sps:$4 sm:$0xff]  }
 0x124   :  { %2279 = vmatprep.subr.bf16.mxu1 %v3152_v46  ;;  %v3234_v46 = vld [vmem:[#allocation6 + $0x790] ss:$24 sps:$4 sm:$0xff]  }
 0x125   :  { %2360 = vmatpush1.bf16.msra.mxu0 %v3147_v47  ;;  %v3239_v47 = vld [vmem:[#allocation6 + $0x7c4] ss:$24 sps:$4 sm:$0xff]  }
 0x126   :  { %2361 = vmatprep.subr.bf16.mxu0 %v3155_v48  ;;  %v3237_v48 = vld [vmem:[#allocation6 + $0x7c0] ss:$24 sps:$4 sm:$0xff]  }
 0x127   :  { %2280 = vmatpush1.bf16.msra.mxu1 %v3150_v50  ;;  %v3242_v50 = vld [vmem:[#allocation6 + $0x7f4] ss:$24 sps:$4 sm:$0xff]  }
 0x128   :  { %2281 = vmatprep.subr.bf16.mxu1 %v3158_v51  ;;  %v3240_v51 = vld [vmem:[#allocation6 + $0x7f0] ss:$24 sps:$4 sm:$0xff]  }
 0x129   :  { %2362 = vmatpush1.bf16.msra.mxu0 %v3153_v52  ;;  %v3245_v52 = vld [vmem:[#allocation6 + $0x824] ss:$24 sps:$4 sm:$0xff]  }
 0x12a   :  { %2363 = vmatprep.subr.bf16.mxu0 %v3161_v53  ;;  %v3243_v53 = vld [vmem:[#allocation6 + $0x820] ss:$24 sps:$4 sm:$0xff]  }
 0x12b   :  { %2282 = vmatpush1.bf16.msra.mxu1 %v3156_v54  ;;  %v3248_v54 = vld [vmem:[#allocation6 + $0x854] ss:$24 sps:$4 sm:$0xff]  }
 0x12c   :  { %2283 = vmatprep.subr.bf16.mxu1 %v3164_v55  ;;  %v3246_v55 = vld [vmem:[#allocation6 + $0x850] ss:$24 sps:$4 sm:$0xff]  }
 0x12d   :  { %2364 = vmatpush1.bf16.msra.mxu0 %v3159_v56  ;;  %v3251_v56 = vld [vmem:[#allocation6 + $0x884] ss:$24 sps:$4 sm:$0xff]  }
 0x12e   :  { %2365 = vmatprep.subr.bf16.mxu0 %v3167_v57  ;;  %v3249_v57 = vld [vmem:[#allocation6 + $0x880] ss:$24 sps:$4 sm:$0xff]  }
 0x12f   :  { %2284 = vmatpush1.bf16.msra.mxu1 %v3162_v58  ;;  %v3254_v58 = vld [vmem:[#allocation6 + $0x8b4] ss:$24 sps:$4 sm:$0xff]  }
 0x130   :  { %2285 = vmatprep.subr.bf16.mxu1 %v3170_v59  ;;  %v3252_v59 = vld [vmem:[#allocation6 + $0x8b0] ss:$24 sps:$4 sm:$0xff]  }
 0x131   :  { %2366 = vmatpush1.bf16.msra.mxu0 %v3165_v61  ;;  %v3257_v61 = vld [vmem:[#allocation6 + $0x8e4] ss:$24 sps:$4 sm:$0xff]  }
 0x132   :  { %2367 = vmatprep.subr.bf16.mxu0 %v3173_v62  ;;  %v3255_v62 = vld [vmem:[#allocation6 + $0x8e0] ss:$24 sps:$4 sm:$0xff]  }
 0x133   :  { %2286 = vmatpush1.bf16.msra.mxu1 %v3168_v63  ;;  %v594_v63 = vsub.s32 0, %v3457_v49 }
 0x134   :  { %2287 = vmatprep.subr.bf16.mxu1 %v3176_v0  ;;  %v590_v0 = vld [vmem:[#allocation8] sm:$0x3f] }
 0x135   :  { %2368 = vmatpush1.bf16.msra.mxu0 %v3171_v1  ;;  %v598_v1 = vsub.s32 1, %v3457_v49 }
 0x136   :  { %2369 = vmatprep.subr.bf16.mxu0 %v3179_v3  ;;  %v595_v3 = vrot.slane %v590_v0, %v594_v63 }
 0x137   :  { %2288 = vmatpush1.bf16.msra.mxu1 %v3174_v4  ;;  %v599_v4 = vrot.slane %v590_v0, %v598_v1 }
 0x138   :  { %2289 = vmatprep.subr.bf16.mxu1 %v3182_v5 }
 0x139   :  { %2370 = vmatpush1.bf16.msra.mxu0 %v3177_v6 }
 0x13a   :  { %2371 = vmatprep.subr.bf16.mxu0 %v3185_v7 }
 0x13b   :  { %2290 = vmatpush1.bf16.msra.mxu1 %v3180_v8 }
 0x13c   :  { %2291 = vmatprep.subr.bf16.mxu1 %v3188_v9 }
 0x13d   :  { %2372 = vmatpush1.bf16.msra.mxu0 %v3183_v10 }
 0x13e   :  { %2373 = vmatprep.subr.bf16.mxu0 %v3191_v11 }
 0x13f   :  { %2292 = vmatpush1.bf16.msra.mxu1 %v3186_v12 }
 0x140   :  { %2293 = vmatprep.subr.bf16.mxu1 %v3194_v13  ;;  %v2437_v13 = vld [vmem:[#allocation9] sm:$0x3f] }
 0x141   :  { %2374 = vmatpush1.bf16.msra.mxu0 %v3189_v14  ;;  %v2442_v14 = vrot.slane %v2437_v13, %v594_v63 }
 0x142   :  { %2375 = vmatprep.subr.bf16.mxu0 %v3197_v15 }
 0x143   :  { %2294 = vmatpush1.bf16.msra.mxu1 %v3192_v16 }
 0x144   :  { %2295 = vmatprep.subr.bf16.mxu1 %v3200_v17 }
 0x145   :  { %2376 = vmatpush1.bf16.msra.mxu0 %v3195_v18 }
 0x146   :  { %2377 = vmatprep.subr.bf16.mxu0 %v3203_v20 }
 0x147   :  { %2296 = vmatpush1.bf16.msra.mxu1 %v3198_v21 }
 0x148   :  { %2297 = vmatprep.subr.bf16.mxu1 %v3206_v22 }
 0x149   :  { %2378 = vmatpush1.bf16.msra.mxu0 %v3201_v23  ;;  %v602_v23 = vsub.s32 2, %v3457_v49 }
 0x14a   :  { %2379 = vmatprep.subr.bf16.mxu0 %v3209_v24  ;;  %v606_v24 = vsub.s32 3, %v3457_v49 }
 0x14b   :  { %2298 = vmatpush1.bf16.msra.mxu1 %v3204_v25  ;;  %v603_v25 = vrot.slane %v590_v0, %v602_v23 }
 0x14d   :  { %2380 = vmatpush1.bf16.msra.mxu0 %v3207_v28  ;;  %v607_v28 = vrot.slane %v590_v0, %v606_v24 }
 0x14e   :  { %2300 = vmatmul.mubr.bf16.vlgmr.msra.gmra.mrb[4].mxu1 %v3494_v19  ;;  %2390 = vmatprep.subr.bf16.mxu0 %v3212_v29 }
 0x150   :  { %2382 = vmatmul.mubr.bf16.vlgmr.msra.gmra.mrb[4].mxu0 %v3476_v30  ;;  %v3225_v30 = vld [vmem:[#allocation6 + $0x700] ss:$24 sps:$4 sm:$0xff]  }
 0x151   :  { %2391 = vmatpush1.bf16.msra.mxu0 %v3210_v31  ;;  %2422 = vmatprep.mubr.bf16.mxu0 %v3491_v2 }
 0x152   :  { %2392 = vmatprep.subr.bf16.mxu0 %v3215_v33 }
 0x155   :  { %2393 = vmatpush1.bf16.msra.mxu0 %v3213_v34 }
 0x156   :  { %2394 = vmatprep.subr.bf16.mxu0 %v3218_v35 }
 0x159   :  { %2395 = vmatpush1.bf16.msra.mxu0 %v3216_v36 }
 0x15a   :  { %2396 = vmatprep.subr.bf16.mxu0 %v3221_v37  ;;  %v2450_v37 = vrot.slane %v2437_v13, %v602_v23 }
 0x15d   :  { %2397 = vmatpush1.bf16.msra.mxu0 %v3219_v38  ;;  %v2454_v38 = vrot.slane %v2437_v13, %v606_v24 }
 0x15e   :  { %2398 = vmatprep.subr.bf16.mxu0 %v3224_v27 }
 0x161   :  { %2399 = vmatpush1.bf16.msra.mxu0 %v3222_v39  ;;  %v2096_v26 = vpop.f32.mrb[0].mxu1 }
 0x162   :  { %2400 = vmatprep.subr.bf16.mxu0 %v3227_v40  ;;  %v2098_v2 = vpop.f32.mrb[1].mxu1  ;;  %v2097_v5 = vadd.f32 %v2096_v26, %v595_v3 }
 0x163   :  { %v2100_v42 = vpop.f32.mrb[2].mxu1  ;;  %v2099_v6 = vadd.f32 %v2098_v2, %v599_v4 }
 0x164   :  { %v2101_v32 = vpop.f32.mrb[3].mxu1 }
 0x165   :  { %2401 = vmatpush1.bf16.msra.mxu0 %v3225_v30  ;;  %v610_v32 = vsub.s32 4, %v3457_v49 }
 0x166   :  { %2402 = vmatprep.subr.bf16.mxu0 %v3230_v41 }
 0x169   :  { %2403 = vmatpush1.bf16.msra.mxu0 %v3228_v43  ;;  %v614_v43 = vsub.s32 5, %v3457_v49 }
 0x16a   :  { %2404 = vmatprep.subr.bf16.mxu0 %v3233_v44  ;;  %v611_v44 = vrot.slane %v590_v0, %v610_v32 }
 0x16d   :  { %2405 = vmatpush1.bf16.msra.mxu0 %v3231_v45  ;;  %v615_v45 = vrot.slane %v590_v0, %v614_v43 }
 0x16e   :  { %2406 = vmatprep.subr.bf16.mxu0 %v3236_v60 }
 0x171   :  { %2407 = vmatpush1.bf16.msra.mxu0 %v3234_v46 }
 0x172   :  { %2408 = vmatprep.subr.bf16.mxu0 %v3239_v47 }
 0x175   :  { %2409 = vmatpush1.bf16.msra.mxu0 %v3237_v48 }
 0x176   :  { %2410 = vmatprep.subr.bf16.mxu0 %v3242_v50 }
 0x179   :  { %2411 = vmatpush1.bf16.msra.mxu0 %v3240_v51 }
 0x17a   :  { %2412 = vmatprep.subr.bf16.mxu0 %v3245_v52  ;;  %v2458_v52 = vrot.slane %v2437_v13, %v610_v32 }
 0x17d   :  { %2413 = vmatpush1.bf16.msra.mxu0 %v3243_v53  ;;  %v2462_v53 = vrot.slane %v2437_v13, %v614_v43 }
 0x17e   :  { %2414 = vmatprep.subr.bf16.mxu0 %v3248_v54 }
 0x181   :  { %2415 = vmatpush1.bf16.msra.mxu0 %v3246_v55 }
 0x182   :  { %2416 = vmatprep.subr.bf16.mxu0 %v3251_v56 }
 0x185   :  { %2417 = vmatpush1.bf16.msra.mxu0 %v3249_v57 }
 0x186   :  { %2418 = vmatprep.subr.bf16.mxu0 %v3254_v58 }
 0x189   :  { %2419 = vmatpush1.bf16.msra.mxu0 %v3252_v59 }
 0x18a   :  { %2420 = vmatprep.subr.bf16.mxu0 %v3257_v61 }
 0x18d   :  { %2421 = vmatpush1.bf16.msra.mxu0 %v3255_v62  ;;  %v2490_v62 = vstv %s3530_s4 }
 0x190   :  { %2423 = vmatmul.mubr.bf16.vlgmr.msra.gmra.mrb[4].mxu0 %v3494_v19  ;;  %v2446_v19 = vrot.slane %v2437_v13, %v598_v1 }
 0x1a3   :  { %v2178_v7 = vpop.f32.mrb[0].mxu0 }
 0x1a4   :  { %v2791_v8 = vadd.f32 %v2178_v7, %v2097_v5  ;;  %v2180_v9 = vpop.f32.mrb[1].mxu0 }
 0x1a5   :  { %v2793_v10 = vadd.f32 %v2180_v9, %v2099_v6  ;;  %v2182_v11 = vpop.f32.mrb[2].mxu0 }
 0x1a6   :  { %3258 = vtanh.f32 %v2791_v8  ;;  %v2183_v12 = vpop.f32.mrb[3].mxu0 }
 0x1a7   :  { %3260 = vtanh.f32 %v2793_v10 }
 0x1b0   :  { %v3259_v15 = vpop.eup %3258 }
 0x1b1   :  { %v3261_v16 = vpop.eup %3260  ;;  %v2469_v17 = vmul.f32 %v3259_v15, %v2442_v14 }
 0x1b2   :  { %v2470_v18 = vmul.f32 %v3261_v16, %v2446_v19 }
 0x1b3   :  { %v2476_v20 = vsel %vm2475_vm4, %v2469_v17, 0.0 }
 0x1b4   :  { %v2477_v21 = vsel %vm2475_vm4, %v2470_v18, 0.0 }
 0x1b5   :  { %v2478_v22 = vadd.f32 %v2477_v21, %v2476_v20 }
 0x221   :  { %v2301_v29 = vpop.f32.mrb[4].mxu1 }
 0x222   :  { %v2794_v31 = vadd.f32 %v2301_v29, %v603_v25  ;;  %v2303_v33 = vpop.f32.mrb[5].mxu1 }
 0x223   :  { %v2795_v34 = vadd.f32 %v2303_v33, %v607_v28  ;;  %v2305_v35 = vpop.f32.mrb[6].mxu1 }
 0x224   :  { %3262 = vtanh.f32 %v2794_v31  ;;  %v2306_v36 = vpop.f32.mrb[7].mxu1 }
 0x225   :  { %3264 = vtanh.f32 %v2795_v34 }
 0x22e   :  { %v3263_v27 = vpop.eup %3262 }
 0x22f   :  { %v3265_v39 = vpop.eup %3264  ;;  %v2471_v40 = vmul.f32 %v3263_v27, %v2450_v37 }
 0x230   :  { %v2472_v30 = vmul.f32 %v3265_v39, %v2454_v38 }
 0x231   :  { %v2479_v26 = vsel %vm2475_vm4, %v2471_v40, 0.0 }
 0x232   :  { %v2480_v41 = vadd.f32 %v2479_v26, %v2478_v22  ;;  %v2481_v2 = vsel %vm2475_vm4, %v2472_v30, 0.0 }
 0x234   :  { %v2482_v42 = vadd.f32 %v2481_v2, %v2480_v41 }
 0x263   :  { %v2424_v60 = vpop.f32.mrb[4].mxu0 }
 0x264   :  { %v2796_v46 = vadd.f32 %v2424_v60, %v611_v44  ;;  %v2426_v47 = vpop.f32.mrb[5].mxu0 }
 0x265   :  { %v2797_v48 = vadd.f32 %v2426_v47, %v615_v45  ;;  %v2428_v50 = vpop.f32.mrb[6].mxu0 }
 0x266   :  { %3266 = vtanh.f32 %v2796_v46  ;;  %v2429_v51 = vpop.f32.mrb[7].mxu0 }
 0x267   :  { %3268 = vtanh.f32 %v2797_v48 }
 0x270   :  { %v3267_v54 = vpop.eup %3266 }
 0x271   :  { %v3269_v55 = vpop.eup %3268  ;;  %v2473_v56 = vmul.f32 %v3267_v54, %v2458_v52 }
 0x272   :  { %v2474_v57 = vmul.f32 %v3269_v55, %v2462_v53 }
 0x273   :  { %v2483_v58 = vsel %vm2475_vm4, %v2473_v56, 0.0 }
 0x274   :  { %v2484_v59 = vadd.f32 %v2483_v58, %v2482_v42  ;;  %v2485_v49 = vsel %vm2475_vm4, %v2474_v57, 0.0 }
 0x276   :  { %v2486_v61 = vadd.f32 %v2485_v49, %v2484_v59 }
 0x278   :  { %2487 = vadd.xlane.f32.xlu0 %v2486_v61 }
 0x305   :  { %v2488_v63 = vpop.xlane.xlu0 %2487 }
 0x306   :  { %v2491_v0 = vadd.f32 %v2490_v62, %v2488_v63 }
 0x308   :  { %2493 = vst.msk [vmem:[%s3531_s5] sm:$0x3] %vm2492_vm5, %v2491_v0 }
 0x309   :  { %2498 = vsyncpa [#allocation5], 1 }
 0x30a   :  { %2499 = vsyncpa [#allocation7], 1 }
 0x30b   :  { %2500 = vsyncpa [#allocation10], 1 }

</bundles_post_ra>
